<compile_context>
chip_gen: v7x
topology: tpu7x:2x2x1
jax: 0.10.0
libtpu: 0.0.40
codegen_flags: <defaults>
</compile_context>

<pallas_src>
import functools

import jax
import jax.numpy as jnp
from jax import lax
from jax.experimental import pallas as pl
from jax.experimental.pallas import tpu as pltpu


def _ru(x, m):
    return ((x + m - 1) // m) * m


def _attention_kernel(method, Wp, LimP, EXT, Cinp, C4p,
                      mask_ref, x_ref, wa_ref, ba_ref, wb_ref, bb_ref, *rest):
    # mask_ref : (1, LimP)  f32, 1.0 on real pixels, 0.0 on padded ring / lane tail
    # x_ref    : (2*Cinp, LTOT) bf16, one image, channels on sublanes, lanes =
    #            [EXT zeros | Hp*Wp padded image | tail zeros | EXT zeros]
    # w*_ref   : (9, Cout_p, Cin_p) bf16 per-tap weights;  b*_ref: (Cout_p, 1) f32
    # out_ref  : (1, LimP) f32 sigmoid output (ring/tail garbage dropped by wrapper)
    # buf_ref  : VMEM (rows, LTOT) bf16 scratch; zero margins act as SAME zero padding
    if method == 'cat':
        wc_ref, bc_ref, ww_ref, bw_ref, out_ref, buf_ref = rest
    else:
        ww_ref, bw_ref, out_ref, buf_ref = rest

    nrows, ltot = buf_ref.shape
    mask = mask_ref[...]                                          # (1, LimP) f32

    def conv3x3(get_tap, w_ref, nout):
        # 3x3 SAME conv as 9 accumulated per-tap MXU matmuls (no im2col buffer).
        acc = jnp.zeros((nout, LimP), jnp.float32)
        for t in range(9):
            dy, dx = divmod(t, 3)
            s = EXT + (dy - 1) * Wp + (dx - 1)
            acc = acc + jnp.dot(w_ref[t], get_tap(s),
                                preferred_element_type=jnp.float32)
        return acc

    # zero only the halo margins of the scratch; interior is fully overwritten below.
    buf_ref[:, 0:EXT] = jnp.zeros((nrows, EXT), buf_ref.dtype)
    buf_ref[:, EXT + LimP:ltot] = jnp.zeros((nrows, ltot - EXT - LimP), buf_ref.dtype)

    # stage 1: fc_a / fc_b as two half-K convs, per-branch bias + ReLU.
    fa = jnp.maximum(conv3x3(lambda s: x_ref[0:Cinp, s:s + LimP], wa_ref, C4p)
                     + ba_ref[...], 0.0)
    fb = jnp.maximum(conv3x3(lambda s: x_ref[Cinp:2 * Cinp, s:s + LimP], wb_ref, C4p)
                     + bb_ref[...], 0.0)

    # fuse + re-apply SAME zero padding (mask zeroes the padded ring and the lane tail).
    if method == 'add':
        buf_ref[0:C4p, EXT:EXT + LimP] = ((fa + fb) * mask).astype(buf_ref.dtype)
    elif method == 'mul':
        buf_ref[0:C4p, EXT:EXT + LimP] = ((fa * fb) * mask).astype(buf_ref.dtype)
    elif method == 'cat':
        buf_ref[0:C4p, EXT:EXT + LimP] = (fa * mask).astype(buf_ref.dtype)
        buf_ref[C4p:2 * C4p, EXT:EXT + LimP] = (fb * mask).astype(buf_ref.dtype)
        g = conv3x3(lambda s: buf_ref[0:2 * C4p, s:s + LimP], wc_ref, C4p) + bc_ref[...]
        buf_ref[0:C4p, EXT:EXT + LimP] = (g * mask).astype(buf_ref.dtype)
    else:
        raise NotImplementedError(method)

    # stage 3: fc_weight conv + sigmoid (only row 0 of the 8-row padded weight is real).
    logits = conv3x3(lambda s: buf_ref[0:C4p, s:s + LimP], ww_ref, 8) + bw_ref[...]
    out_ref[...] = jax.nn.sigmoid(logits[0:1, :]).astype(out_ref.dtype)


def prepack_params(params, dtype=jnp.bfloat16):
    """One-time repack of torch OIHW conv weights into per-tap (9, Cout_p, Cin_p) MXU
    operands and padded bias columns (hoisted out of the per-call forward)."""
    f32 = jnp.float32
    C4, Cin = params['wa'].shape[:2]
    Cinp = _ru(Cin, 16)                       # 16-aligned for clean bf16 sublane packing
    C4p = _ru(C4, 16)

    def taps(w, coutp, cinp):                 # OIHW -> (9, coutp, cinp), tap = dy*3+dx
        o, i = w.shape[:2]
        wt = jnp.transpose(w.astype(f32), (2, 3, 0, 1)).reshape(9, o, i)
        return jnp.zeros((9, coutp, cinp), f32).at[:, :o, :i].set(wt).astype(dtype)

    def bias(b, coutp):
        return jnp.zeros((coutp, 1), f32).at[:b.shape[0], 0].set(b.astype(f32))

    packed = dict(
        wa=taps(params['wa'], C4p, Cinp), ba=bias(params['ba'], C4p),
        wb=taps(params['wb'], C4p, Cinp), bb=bias(params['bb'], C4p),
        ww=taps(params['ww'], 8, C4p),    bw=bias(params['bw'], 8),
    )
    # fc_cat: its input channels 0:C4 (fc_a) live at buf rows 0:C4 and channels
    # C4:2*C4 (fc_b) at buf rows C4p:C4p+C4 -> scatter the kernel's K axis accordingly.
    wct = jnp.transpose(params['wcat'].astype(f32), (2, 3, 0, 1)).reshape(9, C4, 2 * C4)
    wc = jnp.zeros((9, C4p, 2 * C4p), f32)
    wc = wc.at[:, :C4, :C4].set(wct[:, :, :C4])
    wc = wc.at[:, :C4, C4p:C4p + C4].set(wct[:, :, C4:])
    packed['wc'] = wc.astype(dtype)
    packed['bc'] = bias(params['bcat'], C4p)
    return packed


def _const_spec(arr):
    if arr.ndim == 2:
        return pl.BlockSpec(arr.shape, lambda i: (0, 0))
    return pl.BlockSpec(arr.shape, lambda i: (0, 0, 0))


@functools.partial(jax.jit, static_argnames=('method',))
def attention_forward(x_part1, x_part2, packed, method='add'):
    """x_part*: (N, Cin, H, W) f32 NCHW. packed: prepack_params() output.
    Returns the attention weight map (N, 1, H, W) f32."""
    N, Cin, H, W = x_part1.shape
    C4p, Cinp = packed['wa'].shape[1], packed['wa'].shape[2]
    Hp, Wp = H + 2, W + 2
    Lim = Hp * Wp
    LimP = _ru(Lim, 128)                 # lane-dense interior width
    EXT = _ru(Wp + 1, 128)               # halo margin covering the max 3x3 tap shift
    LTOT = 2 * EXT + LimP
    f32, bf16 = jnp.float32, jnp.bfloat16

    # TODO(synk): for single images whose (2*Cinp, LTOT) tile would not fit VMEM (very
    # large feature maps under v7x's 64 MiB), additionally tile the lane axis inside an
    # image with a (Wp+1)-lane halo on x/buf.

    # activations: NCHW -> per-image (2*Cinp, LTOT) bf16 with zero ring / margins / tail.
    def prep(xp):
        return jnp.pad(xp.astype(f32), ((0, 0), (0, Cinp - Cin), (0, 0), (0, 0)))
    x = jnp.concatenate([prep(x_part1), prep(x_part2)], axis=1)   # (N, 2*Cinp, H, W)
    x = jnp.pad(x, ((0, 0), (0, 0), (1, 1), (1, 1)))              # spatial zero ring
    x = x.reshape(N, 2 * Cinp, Lim)
    x = jnp.pad(x, ((0, 0), (0, 0), (EXT, EXT + LimP - Lim))).astype(bf16)

    # interior mask: 1 on real pixels, 0 on the padded ring and the lane-pad tail.
    m = jnp.zeros((Hp, Wp), f32).at[1:H + 1, 1:W + 1].set(1.0).reshape(1, Lim)
    mask = jnp.pad(m, ((0, 0), (0, LimP - Lim)))

    weights = [packed['wa'], packed['ba'], packed['wb'], packed['bb']]
    if method == 'cat':                       # only DMA fc_cat weights when used
        weights += [packed['wc'], packed['bc']]
    weights += [packed['ww'], packed['bw']]
    operands = [mask, x] + weights

    buf_rows = 2 * C4p if method == 'cat' else C4p

    in_specs = [pl.BlockSpec((1, LimP), lambda i: (0, 0)),
                pl.BlockSpec((None, 2 * Cinp, LTOT), lambda i: (i, 0, 0))]
    in_specs += [_const_spec(w) for w in weights]

    # per-step VMEM footprint: double-buffered x/out blocks + resident weights + scratch.
    bytes_x = 2 * (2 * Cinp * LTOT * 2)
    bytes_out = 2 * (LimP * 4)
    bytes_w = 2 * sum(int(w.size) * w.dtype.itemsize for w in [mask] + weights)
    bytes_scratch = buf_rows * LTOT * 2
    vmem_limit = int(min(bytes_x + bytes_out + bytes_w + bytes_scratch + (8 << 20),
                         128 * 1024 * 1024))

    kernel = functools.partial(_attention_kernel, method, Wp, LimP, EXT, Cinp, C4p)
    out = pl.pallas_call(
        kernel,
        out_shape=jax.ShapeDtypeStruct((N, 1, LimP), f32),
        grid=(N,),                                     # one image per step: pipelined x
        in_specs=in_specs,                             # DMA, 2 TCs on v7x take images
        out_specs=pl.BlockSpec((None, 1, LimP), lambda i: (i, 0, 0)),
        scratch_shapes=[pltpu.VMEM((buf_rows, LTOT), bf16)],
        compiler_params=pltpu.CompilerParams(
            dimension_semantics=("parallel",),
            vmem_limit_bytes=vmem_limit),
    )(*operands)

    # (N, 1, LimP) -> (N, 1, H, W): drop the padded ring and the lane-pad tail.
    out = out[:, 0, :Lim].reshape(N, Hp, Wp)[:, 1:H + 1, 1:W + 1]
    return out.reshape(N, 1, H, W)


def init_params(key, in_channels):
    """Torch-layout (OIHW) params.  The module zero-inits biases; small random biases
    are used here so the kernel's bias path is actually exercised."""
    C4 = in_channels // 4
    C2 = in_channels // 2
    ks = jax.random.split(key, 8)
    w = lambda k, o, i: 0.01 * jax.random.normal(k, (o, i, 3, 3), jnp.float32)
    b = lambda k, o: 0.1 * jax.random.normal(k, (o,), jnp.float32)
    return dict(
        wa=w(ks[0], C4, in_channels), ba=b(ks[1], C4),
        wb=w(ks[2], C4, in_channels), bb=b(ks[3], C4),
        wcat=w(ks[4], C4, C2),        bcat=b(ks[5], C4),
        ww=w(ks[6], 1, C4),           bw=b(ks[7], 1),
    )


# -------- plain-JAX reference (NCHW, torch semantics) for verification --------
def attention_ref(x1, x2, p, method='add'):
    def conv(x, w, b):
        y = lax.conv_general_dilated(x, w, (1, 1), 'SAME',
                                     dimension_numbers=('NCHW', 'OIHW', 'NCHW'),
                                     precision=lax.Precision.HIGHEST)
        return y + b.reshape(1, -1, 1, 1)

    fa = jax.nn.relu(conv(x1, p['wa'], p['ba']))
    fb = jax.nn.relu(conv(x2, p['wb'], p['bb']))
    if method == 'add':
        fused = fa + fb
    elif method == 'mul':
        fused = fa * fb
    elif method == 'cat':
        fused = conv(jnp.concatenate([fa, fb], axis=1), p['wcat'], p['bcat'])
    else:
        raise NotImplementedError(method)
    return jax.nn.sigmoid(conv(fused, p['ww'], p['bw']))


if __name__ == "__main__":
    key = jax.random.PRNGKey(0)
    in_channels = 16
    N, H, W = 2, 16, 16

    k1, k2, kp = jax.random.split(key, 3)
    x_part1 = jax.random.normal(k1, (N, in_channels, H, W), jnp.float32)
    x_part2 = jax.random.normal(k2, (N, in_channels, H, W), jnp.float32)
    params = init_params(kp, in_channels)
    packed = prepack_params(params)           # one-time weight repack (hoisted out)

    for method in ('add', 'mul', 'cat'):      # cfg.SOLVER.ATT_METHOD options
        out = jax.block_until_ready(
            attention_forward(x_part1, x_part2, packed, method=method))
        ref = attention_ref(x_part1, x_part2, params, method=method)
        assert out.shape == (N, 1, H, W)
        err = float(jnp.max(jnp.abs(out - ref)))
        assert err < 2e-3, (method, err)      # bf16 operands, f32 accumulation
    print("KERNEL_OK")
</pallas_src>

<mosaic_0001>
module attributes {stable_mosaic.version = 11 : i64} {
  func.func @_attention_kernel(%arg0: i32, %arg1: memref<1x384xf32, #tpu.memory_space<vmem>>, %arg2: memref<1x32x640xbf16, #tpu.memory_space<vmem>>, %arg3: memref<9x16x16xbf16, #tpu.memory_space<vmem>>, %arg4: memref<16x1xf32, #tpu.memory_space<vmem>>, %arg5: memref<9x16x16xbf16, #tpu.memory_space<vmem>>, %arg6: memref<16x1xf32, #tpu.memory_space<vmem>>, %arg7: memref<9x8x16xbf16, #tpu.memory_space<vmem>>, %arg8: memref<8x1xf32, #tpu.memory_space<vmem>>, %arg9: memref<1x1x384xf32, #tpu.memory_space<vmem>>, %arg10: memref<16x640xbf16, #tpu.memory_space<vmem>>) attributes {dimension_semantics = [#tpu.dimension_semantics<parallel>], iteration_bounds = array<i64: 2>, scalar_prefetch = 0 : i64, scratch_operands = 1 : i64, tpu.core_type = #tpu.core_type<tc>, window_params = [{pipeline_mode = #tpu.pipeline_mode<synchronous>, transform_indices = @transform_0, window_bounds = array<i64: 1, 384>}, {transform_indices = @transform_1, window_bounds = array<i64: 1, 32, 640>}, {pipeline_mode = #tpu.pipeline_mode<synchronous>, transform_indices = @transform_2, window_bounds = array<i64: 9, 16, 16>}, {pipeline_mode = #tpu.pipeline_mode<synchronous>, transform_indices = @transform_3, window_bounds = array<i64: 16, 1>}, {pipeline_mode = #tpu.pipeline_mode<synchronous>, transform_indices = @transform_4, window_bounds = array<i64: 9, 16, 16>}, {pipeline_mode = #tpu.pipeline_mode<synchronous>, transform_indices = @transform_5, window_bounds = array<i64: 16, 1>}, {pipeline_mode = #tpu.pipeline_mode<synchronous>, transform_indices = @transform_6, window_bounds = array<i64: 9, 8, 16>}, {pipeline_mode = #tpu.pipeline_mode<synchronous>, transform_indices = @transform_7, window_bounds = array<i64: 8, 1>}, {transform_indices = @transform_8, window_bounds = array<i64: 1, 1, 384>}]} {
    %c0 = arith.constant 0 : index
    %c0_0 = arith.constant 0 : index
    %0 = vector.load %arg1[%c0, %c0_0] : memref<1x384xf32, #tpu.memory_space<vmem>>, vector<1x384xf32>
    %cst = arith.constant 0.000000e+00 : bf16
    %1 = vector.broadcast %cst : bf16 to vector<16x128xbf16>
    %c0_1 = arith.constant 0 : index
    %c0_2 = arith.constant 0 : index
    %2 = vector.load %arg10[%c0_1, %c0_2] : memref<16x640xbf16, #tpu.memory_space<vmem>>, vector<16x128xbf16>
    tpu.vector_store %arg10[%c0_1, %c0_2], %1 {strides = array<i32>} : memref<16x640xbf16, #tpu.memory_space<vmem>>, vector<16x128xbf16>,
    %cst_3 = arith.constant 0.000000e+00 : bf16
    %3 = vector.broadcast %cst_3 : bf16 to vector<16x128xbf16>
    %c0_4 = arith.constant 0 : index
    %c512 = arith.constant 512 : index
    %4 = vector.load %arg10[%c0_4, %c512] : memref<16x640xbf16, #tpu.memory_space<vmem>>, vector<16x128xbf16>
    tpu.vector_store %arg10[%c0_4, %c512], %3 {strides = array<i32>} : memref<16x640xbf16, #tpu.memory_space<vmem>>, vector<16x128xbf16>,
    %cst_5 = arith.constant 0.000000e+00 : f32
    %5 = vector.broadcast %cst_5 : f32 to vector<16x384xf32>
    %c0_6 = arith.constant 0 : index
    %c0_7 = arith.constant 0 : index
    %c0_8 = arith.constant 0 : index
    %6 = vector.load %arg3[%c0_6, %c0_7, %c0_8] : memref<9x16x16xbf16, #tpu.memory_space<vmem>>, vector<1x16x16xbf16>
    %7 = vector.shape_cast %6 : vector<1x16x16xbf16> to vector<16x16xbf16>
    %c0_9 = arith.constant 0 : index
    %c0_10 = arith.constant 0 : index
    %c109 = arith.constant 109 : index
    %8 = vector.load %arg2[%c0_9, %c0_10, %c109] : memref<1x32x640xbf16, #tpu.memory_space<vmem>>, vector<1x16x384xbf16>
    %9 = vector.shape_cast %8 : vector<1x16x384xbf16> to vector<16x384xbf16>
    %cst_11 = arith.constant dense<0.000000e+00> : vector<16x384xf32>
    %10 = tpu.matmul %7, %9, %cst_11 {dimension_numbers = #tpu.dot_dimension_numbers<[1], [0], [0], [1], [0, 0, 1, 1], [], []>} : vector<16x16xbf16>, vector<16x384xbf16>, vector<16x384xf32> -> vector<16x384xf32>
    %11 = arith.addf %5, %10 : vector<16x384xf32>
    %c1 = arith.constant 1 : index
    %c0_12 = arith.constant 0 : index
    %c0_13 = arith.constant 0 : index
    %12 = vector.load %arg3[%c1, %c0_12, %c0_13] : memref<9x16x16xbf16, #tpu.memory_space<vmem>>, vector<1x16x16xbf16>
    %13 = vector.shape_cast %12 : vector<1x16x16xbf16> to vector<16x16xbf16>
    %c0_14 = arith.constant 0 : index
    %c0_15 = arith.constant 0 : index
    %c110 = arith.constant 110 : index
    %14 = vector.load %arg2[%c0_14, %c0_15, %c110] : memref<1x32x640xbf16, #tpu.memory_space<vmem>>, vector<1x16x384xbf16>
    %15 = vector.shape_cast %14 : vector<1x16x384xbf16> to vector<16x384xbf16>
    %cst_16 = arith.constant dense<0.000000e+00> : vector<16x384xf32>
    %16 = tpu.matmul %13, %15, %cst_16 {dimension_numbers = #tpu.dot_dimension_numbers<[1], [0], [0], [1], [0, 0, 1, 1], [], []>} : vector<16x16xbf16>, vector<16x384xbf16>, vector<16x384xf32> -> vector<16x384xf32>
    %17 = arith.addf %11, %16 : vector<16x384xf32>
    %c2 = arith.constant 2 : index
    %c0_17 = arith.constant 0 : index
    %c0_18 = arith.constant 0 : index
    %18 = vector.load %arg3[%c2, %c0_17, %c0_18] : memref<9x16x16xbf16, #tpu.memory_space<vmem>>, vector<1x16x16xbf16>
    %19 = vector.shape_cast %18 : vector<1x16x16xbf16> to vector<16x16xbf16>
    %c0_19 = arith.constant 0 : index
    %c0_20 = arith.constant 0 : index
    %c111 = arith.constant 111 : index
    %20 = vector.load %arg2[%c0_19, %c0_20, %c111] : memref<1x32x640xbf16, #tpu.memory_space<vmem>>, vector<1x16x384xbf16>
    %21 = vector.shape_cast %20 : vector<1x16x384xbf16> to vector<16x384xbf16>
    %cst_21 = arith.constant dense<0.000000e+00> : vector<16x384xf32>
    %22 = tpu.matmul %19, %21, %cst_21 {dimension_numbers = #tpu.dot_dimension_numbers<[1], [0], [0], [1], [0, 0, 1, 1], [], []>} : vector<16x16xbf16>, vector<16x384xbf16>, vector<16x384xf32> -> vector<16x384xf32>
    %23 = arith.addf %17, %22 : vector<16x384xf32>
    %c3 = arith.constant 3 : index
    %c0_22 = arith.constant 0 : index
    %c0_23 = arith.constant 0 : index
    %24 = vector.load %arg3[%c3, %c0_22, %c0_23] : memref<9x16x16xbf16, #tpu.memory_space<vmem>>, vector<1x16x16xbf16>
    %25 = vector.shape_cast %24 : vector<1x16x16xbf16> to vector<16x16xbf16>
    %c0_24 = arith.constant 0 : index
    %c0_25 = arith.constant 0 : index
    %c127 = arith.constant 127 : index
    %26 = vector.load %arg2[%c0_24, %c0_25, %c127] : memref<1x32x640xbf16, #tpu.memory_space<vmem>>, vector<1x16x384xbf16>
    %27 = vector.shape_cast %26 : vector<1x16x384xbf16> to vector<16x384xbf16>
    %cst_26 = arith.constant dense<0.000000e+00> : vector<16x384xf32>
    %28 = tpu.matmul %25, %27, %cst_26 {dimension_numbers = #tpu.dot_dimension_numbers<[1], [0], [0], [1], [0, 0, 1, 1], [], []>} : vector<16x16xbf16>, vector<16x384xbf16>, vector<16x384xf32> -> vector<16x384xf32>
    %29 = arith.addf %23, %28 : vector<16x384xf32>
    %c4 = arith.constant 4 : index
    %c0_27 = arith.constant 0 : index
    %c0_28 = arith.constant 0 : index
    %30 = vector.load %arg3[%c4, %c0_27, %c0_28] : memref<9x16x16xbf16, #tpu.memory_space<vmem>>, vector<1x16x16xbf16>
    %31 = vector.shape_cast %30 : vector<1x16x16xbf16> to vector<16x16xbf16>
    %c0_29 = arith.constant 0 : index
    %c0_30 = arith.constant 0 : index
    %c128 = arith.constant 128 : index
    %32 = vector.load %arg2[%c0_29, %c0_30, %c128] : memref<1x32x640xbf16, #tpu.memory_space<vmem>>, vector<1x16x384xbf16>
    %33 = vector.shape_cast %32 : vector<1x16x384xbf16> to vector<16x384xbf16>
    %cst_31 = arith.constant dense<0.000000e+00> : vector<16x384xf32>
    %34 = tpu.matmul %31, %33, %cst_31 {dimension_numbers = #tpu.dot_dimension_numbers<[1], [0], [0], [1], [0, 0, 1, 1], [], []>} : vector<16x16xbf16>, vector<16x384xbf16>, vector<16x384xf32> -> vector<16x384xf32>
    %35 = arith.addf %29, %34 : vector<16x384xf32>
    %c5 = arith.constant 5 : index
    %c0_32 = arith.constant 0 : index
    %c0_33 = arith.constant 0 : index
    %36 = vector.load %arg3[%c5, %c0_32, %c0_33] : memref<9x16x16xbf16, #tpu.memory_space<vmem>>, vector<1x16x16xbf16>
    %37 = vector.shape_cast %36 : vector<1x16x16xbf16> to vector<16x16xbf16>
    %c0_34 = arith.constant 0 : index
    %c0_35 = arith.constant 0 : index
    %c129 = arith.constant 129 : index
    %38 = vector.load %arg2[%c0_34, %c0_35, %c129] : memref<1x32x640xbf16, #tpu.memory_space<vmem>>, vector<1x16x384xbf16>
    %39 = vector.shape_cast %38 : vector<1x16x384xbf16> to vector<16x384xbf16>
    %cst_36 = arith.constant dense<0.000000e+00> : vector<16x384xf32>
    %40 = tpu.matmul %37, %39, %cst_36 {dimension_numbers = #tpu.dot_dimension_numbers<[1], [0], [0], [1], [0, 0, 1, 1], [], []>} : vector<16x16xbf16>, vector<16x384xbf16>, vector<16x384xf32> -> vector<16x384xf32>
    %41 = arith.addf %35, %40 : vector<16x384xf32>
    %c6 = arith.constant 6 : index
    %c0_37 = arith.constant 0 : index
    %c0_38 = arith.constant 0 : index
    %42 = vector.load %arg3[%c6, %c0_37, %c0_38] : memref<9x16x16xbf16, #tpu.memory_space<vmem>>, vector<1x16x16xbf16>
    %43 = vector.shape_cast %42 : vector<1x16x16xbf16> to vector<16x16xbf16>
    %c0_39 = arith.constant 0 : index
    %c0_40 = arith.constant 0 : index
    %c145 = arith.constant 145 : index
    %44 = vector.load %arg2[%c0_39, %c0_40, %c145] : memref<1x32x640xbf16, #tpu.memory_space<vmem>>, vector<1x16x384xbf16>
    %45 = vector.shape_cast %44 : vector<1x16x384xbf16> to vector<16x384xbf16>
    %cst_41 = arith.constant dense<0.000000e+00> : vector<16x384xf32>
    %46 = tpu.matmul %43, %45, %cst_41 {dimension_numbers = #tpu.dot_dimension_numbers<[1], [0], [0], [1], [0, 0, 1, 1], [], []>} : vector<16x16xbf16>, vector<16x384xbf16>, vector<16x384xf32> -> vector<16x384xf32>
    %47 = arith.addf %41, %46 : vector<16x384xf32>
    %c7 = arith.constant 7 : index
    %c0_42 = arith.constant 0 : index
    %c0_43 = arith.constant 0 : index
    %48 = vector.load %arg3[%c7, %c0_42, %c0_43] : memref<9x16x16xbf16, #tpu.memory_space<vmem>>, vector<1x16x16xbf16>
    %49 = vector.shape_cast %48 : vector<1x16x16xbf16> to vector<16x16xbf16>
    %c0_44 = arith.constant 0 : index
    %c0_45 = arith.constant 0 : index
    %c146 = arith.constant 146 : index
    %50 = vector.load %arg2[%c0_44, %c0_45, %c146] : memref<1x32x640xbf16, #tpu.memory_space<vmem>>, vector<1x16x384xbf16>
    %51 = vector.shape_cast %50 : vector<1x16x384xbf16> to vector<16x384xbf16>
    %cst_46 = arith.constant dense<0.000000e+00> : vector<16x384xf32>
    %52 = tpu.matmul %49, %51, %cst_46 {dimension_numbers = #tpu.dot_dimension_numbers<[1], [0], [0], [1], [0, 0, 1, 1], [], []>} : vector<16x16xbf16>, vector<16x384xbf16>, vector<16x384xf32> -> vector<16x384xf32>
    %53 = arith.addf %47, %52 : vector<16x384xf32>
    %c8 = arith.constant 8 : index
    %c0_47 = arith.constant 0 : index
    %c0_48 = arith.constant 0 : index
    %54 = vector.load %arg3[%c8, %c0_47, %c0_48] : memref<9x16x16xbf16, #tpu.memory_space<vmem>>, vector<1x16x16xbf16>
    %55 = vector.shape_cast %54 : vector<1x16x16xbf16> to vector<16x16xbf16>
    %c0_49 = arith.constant 0 : index
    %c0_50 = arith.constant 0 : index
    %c147 = arith.constant 147 : index
    %56 = vector.load %arg2[%c0_49, %c0_50, %c147] : memref<1x32x640xbf16, #tpu.memory_space<vmem>>, vector<1x16x384xbf16>
    %57 = vector.shape_cast %56 : vector<1x16x384xbf16> to vector<16x384xbf16>
    %cst_51 = arith.constant dense<0.000000e+00> : vector<16x384xf32>
    %58 = tpu.matmul %55, %57, %cst_51 {dimension_numbers = #tpu.dot_dimension_numbers<[1], [0], [0], [1], [0, 0, 1, 1], [], []>} : vector<16x16xbf16>, vector<16x384xbf16>, vector<16x384xf32> -> vector<16x384xf32>
    %59 = arith.addf %53, %58 : vector<16x384xf32>
    %c0_52 = arith.constant 0 : index
    %c0_53 = arith.constant 0 : index
    %60 = vector.load %arg4[%c0_52, %c0_53] : memref<16x1xf32, #tpu.memory_space<vmem>>, vector<16x1xf32>
    %61 = vector.broadcast %60 : vector<16x1xf32> to vector<16x384xf32>
    %62 = arith.addf %59, %61 : vector<16x384xf32>
    %cst_54 = arith.constant 0.000000e+00 : f32
    %63 = vector.broadcast %cst_54 : f32 to vector<16x384xf32>
    %64 = arith.maximumf %62, %63 : vector<16x384xf32>
    %cst_55 = arith.constant 0.000000e+00 : f32
    %65 = vector.broadcast %cst_55 : f32 to vector<16x384xf32>
    %c0_56 = arith.constant 0 : index
    %c0_57 = arith.constant 0 : index
    %c0_58 = arith.constant 0 : index
    %66 = vector.load %arg5[%c0_56, %c0_57, %c0_58] : memref<9x16x16xbf16, #tpu.memory_space<vmem>>, vector<1x16x16xbf16>
    %67 = vector.shape_cast %66 : vector<1x16x16xbf16> to vector<16x16xbf16>
    %c0_59 = arith.constant 0 : index
    %c16 = arith.constant 16 : index
    %c109_60 = arith.constant 109 : index
    %68 = vector.load %arg2[%c0_59, %c16, %c109_60] : memref<1x32x640xbf16, #tpu.memory_space<vmem>>, vector<1x16x384xbf16>
    %69 = vector.shape_cast %68 : vector<1x16x384xbf16> to vector<16x384xbf16>
    %cst_61 = arith.constant dense<0.000000e+00> : vector<16x384xf32>
    %70 = tpu.matmul %67, %69, %cst_61 {dimension_numbers = #tpu.dot_dimension_numbers<[1], [0], [0], [1], [0, 0, 1, 1], [], []>} : vector<16x16xbf16>, vector<16x384xbf16>, vector<16x384xf32> -> vector<16x384xf32>
    %71 = arith.addf %65, %70 : vector<16x384xf32>
    %c1_62 = arith.constant 1 : index
    %c0_63 = arith.constant 0 : index
    %c0_64 = arith.constant 0 : index
    %72 = vector.load %arg5[%c1_62, %c0_63, %c0_64] : memref<9x16x16xbf16, #tpu.memory_space<vmem>>, vector<1x16x16xbf16>
    %73 = vector.shape_cast %72 : vector<1x16x16xbf16> to vector<16x16xbf16>
    %c0_65 = arith.constant 0 : index
    %c16_66 = arith.constant 16 : index
    %c110_67 = arith.constant 110 : index
    %74 = vector.load %arg2[%c0_65, %c16_66, %c110_67] : memref<1x32x640xbf16, #tpu.memory_space<vmem>>, vector<1x16x384xbf16>
    %75 = vector.shape_cast %74 : vector<1x16x384xbf16> to vector<16x384xbf16>
    %cst_68 = arith.constant dense<0.000000e+00> : vector<16x384xf32>
    %76 = tpu.matmul %73, %75, %cst_68 {dimension_numbers = #tpu.dot_dimension_numbers<[1], [0], [0], [1], [0, 0, 1, 1], [], []>} : vector<16x16xbf16>, vector<16x384xbf16>, vector<16x384xf32> -> vector<16x384xf32>
    %77 = arith.addf %71, %76 : vector<16x384xf32>
    %c2_69 = arith.constant 2 : index
    %c0_70 = arith.constant 0 : index
    %c0_71 = arith.constant 0 : index
    %78 = vector.load %arg5[%c2_69, %c0_70, %c0_71] : memref<9x16x16xbf16, #tpu.memory_space<vmem>>, vector<1x16x16xbf16>
    %79 = vector.shape_cast %78 : vector<1x16x16xbf16> to vector<16x16xbf16>
    %c0_72 = arith.constant 0 : index
    %c16_73 = arith.constant 16 : index
    %c111_74 = arith.constant 111 : index
    %80 = vector.load %arg2[%c0_72, %c16_73, %c111_74] : memref<1x32x640xbf16, #tpu.memory_space<vmem>>, vector<1x16x384xbf16>
    %81 = vector.shape_cast %80 : vector<1x16x384xbf16> to vector<16x384xbf16>
    %cst_75 = arith.constant dense<0.000000e+00> : vector<16x384xf32>
    %82 = tpu.matmul %79, %81, %cst_75 {dimension_numbers = #tpu.dot_dimension_numbers<[1], [0], [0], [1], [0, 0, 1, 1], [], []>} : vector<16x16xbf16>, vector<16x384xbf16>, vector<16x384xf32> -> vector<16x384xf32>
    %83 = arith.addf %77, %82 : vector<16x384xf32>
    %c3_76 = arith.constant 3 : index
    %c0_77 = arith.constant 0 : index
    %c0_78 = arith.constant 0 : index
    %84 = vector.load %arg5[%c3_76, %c0_77, %c0_78] : memref<9x16x16xbf16, #tpu.memory_space<vmem>>, vector<1x16x16xbf16>
    %85 = vector.shape_cast %84 : vector<1x16x16xbf16> to vector<16x16xbf16>
    %c0_79 = arith.constant 0 : index
    %c16_80 = arith.constant 16 : index
    %c127_81 = arith.constant 127 : index
    %86 = vector.load %arg2[%c0_79, %c16_80, %c127_81] : memref<1x32x640xbf16, #tpu.memory_space<vmem>>, vector<1x16x384xbf16>
    %87 = vector.shape_cast %86 : vector<1x16x384xbf16> to vector<16x384xbf16>
    %cst_82 = arith.constant dense<0.000000e+00> : vector<16x384xf32>
    %88 = tpu.matmul %85, %87, %cst_82 {dimension_numbers = #tpu.dot_dimension_numbers<[1], [0], [0], [1], [0, 0, 1, 1], [], []>} : vector<16x16xbf16>, vector<16x384xbf16>, vector<16x384xf32> -> vector<16x384xf32>
    %89 = arith.addf %83, %88 : vector<16x384xf32>
    %c4_83 = arith.constant 4 : index
    %c0_84 = arith.constant 0 : index
    %c0_85 = arith.constant 0 : index
    %90 = vector.load %arg5[%c4_83, %c0_84, %c0_85] : memref<9x16x16xbf16, #tpu.memory_space<vmem>>, vector<1x16x16xbf16>
    %91 = vector.shape_cast %90 : vector<1x16x16xbf16> to vector<16x16xbf16>
    %c0_86 = arith.constant 0 : index
    %c16_87 = arith.constant 16 : index
    %c128_88 = arith.constant 128 : index
    %92 = vector.load %arg2[%c0_86, %c16_87, %c128_88] : memref<1x32x640xbf16, #tpu.memory_space<vmem>>, vector<1x16x384xbf16>
    %93 = vector.shape_cast %92 : vector<1x16x384xbf16> to vector<16x384xbf16>
    %cst_89 = arith.constant dense<0.000000e+00> : vector<16x384xf32>
    %94 = tpu.matmul %91, %93, %cst_89 {dimension_numbers = #tpu.dot_dimension_numbers<[1], [0], [0], [1], [0, 0, 1, 1], [], []>} : vector<16x16xbf16>, vector<16x384xbf16>, vector<16x384xf32> -> vector<16x384xf32>
    %95 = arith.addf %89, %94 : vector<16x384xf32>
    %c5_90 = arith.constant 5 : index
    %c0_91 = arith.constant 0 : index
    %c0_92 = arith.constant 0 : index
    %96 = vector.load %arg5[%c5_90, %c0_91, %c0_92] : memref<9x16x16xbf16, #tpu.memory_space<vmem>>, vector<1x16x16xbf16>
    %97 = vector.shape_cast %96 : vector<1x16x16xbf16> to vector<16x16xbf16>
    %c0_93 = arith.constant 0 : index
    %c16_94 = arith.constant 16 : index
    %c129_95 = arith.constant 129 : index
    %98 = vector.load %arg2[%c0_93, %c16_94, %c129_95] : memref<1x32x640xbf16, #tpu.memory_space<vmem>>, vector<1x16x384xbf16>
    %99 = vector.shape_cast %98 : vector<1x16x384xbf16> to vector<16x384xbf16>
    %cst_96 = arith.constant dense<0.000000e+00> : vector<16x384xf32>
    %100 = tpu.matmul %97, %99, %cst_96 {dimension_numbers = #tpu.dot_dimension_numbers<[1], [0], [0], [1], [0, 0, 1, 1], [], []>} : vector<16x16xbf16>, vector<16x384xbf16>, vector<16x384xf32> -> vector<16x384xf32>
    %101 = arith.addf %95, %100 : vector<16x384xf32>
    %c6_97 = arith.constant 6 : index
    %c0_98 = arith.constant 0 : index
    %c0_99 = arith.constant 0 : index
    %102 = vector.load %arg5[%c6_97, %c0_98, %c0_99] : memref<9x16x16xbf16, #tpu.memory_space<vmem>>, vector<1x16x16xbf16>
    %103 = vector.shape_cast %102 : vector<1x16x16xbf16> to vector<16x16xbf16>
    %c0_100 = arith.constant 0 : index
    %c16_101 = arith.constant 16 : index
    %c145_102 = arith.constant 145 : index
    %104 = vector.load %arg2[%c0_100, %c16_101, %c145_102] : memref<1x32x640xbf16, #tpu.memory_space<vmem>>, vector<1x16x384xbf16>
    %105 = vector.shape_cast %104 : vector<1x16x384xbf16> to vector<16x384xbf16>
    %cst_103 = arith.constant dense<0.000000e+00> : vector<16x384xf32>
    %106 = tpu.matmul %103, %105, %cst_103 {dimension_numbers = #tpu.dot_dimension_numbers<[1], [0], [0], [1], [0, 0, 1, 1], [], []>} : vector<16x16xbf16>, vector<16x384xbf16>, vector<16x384xf32> -> vector<16x384xf32>
    %107 = arith.addf %101, %106 : vector<16x384xf32>
    %c7_104 = arith.constant 7 : index
    %c0_105 = arith.constant 0 : index
    %c0_106 = arith.constant 0 : index
    %108 = vector.load %arg5[%c7_104, %c0_105, %c0_106] : memref<9x16x16xbf16, #tpu.memory_space<vmem>>, vector<1x16x16xbf16>
    %109 = vector.shape_cast %108 : vector<1x16x16xbf16> to vector<16x16xbf16>
    %c0_107 = arith.constant 0 : index
    %c16_108 = arith.constant 16 : index
    %c146_109 = arith.constant 146 : index
    %110 = vector.load %arg2[%c0_107, %c16_108, %c146_109] : memref<1x32x640xbf16, #tpu.memory_space<vmem>>, vector<1x16x384xbf16>
    %111 = vector.shape_cast %110 : vector<1x16x384xbf16> to vector<16x384xbf16>
    %cst_110 = arith.constant dense<0.000000e+00> : vector<16x384xf32>
    %112 = tpu.matmul %109, %111, %cst_110 {dimension_numbers = #tpu.dot_dimension_numbers<[1], [0], [0], [1], [0, 0, 1, 1], [], []>} : vector<16x16xbf16>, vector<16x384xbf16>, vector<16x384xf32> -> vector<16x384xf32>
    %113 = arith.addf %107, %112 : vector<16x384xf32>
    %c8_111 = arith.constant 8 : index
    %c0_112 = arith.constant 0 : index
    %c0_113 = arith.constant 0 : index
    %114 = vector.load %arg5[%c8_111, %c0_112, %c0_113] : memref<9x16x16xbf16, #tpu.memory_space<vmem>>, vector<1x16x16xbf16>
    %115 = vector.shape_cast %114 : vector<1x16x16xbf16> to vector<16x16xbf16>
    %c0_114 = arith.constant 0 : index
    %c16_115 = arith.constant 16 : index
    %c147_116 = arith.constant 147 : index
    %116 = vector.load %arg2[%c0_114, %c16_115, %c147_116] : memref<1x32x640xbf16, #tpu.memory_space<vmem>>, vector<1x16x384xbf16>
    %117 = vector.shape_cast %116 : vector<1x16x384xbf16> to vector<16x384xbf16>
    %cst_117 = arith.constant dense<0.000000e+00> : vector<16x384xf32>
    %118 = tpu.matmul %115, %117, %cst_117 {dimension_numbers = #tpu.dot_dimension_numbers<[1], [0], [0], [1], [0, 0, 1, 1], [], []>} : vector<16x16xbf16>, vector<16x384xbf16>, vector<16x384xf32> -> vector<16x384xf32>
    %119 = arith.addf %113, %118 : vector<16x384xf32>
    %c0_118 = arith.constant 0 : index
    %c0_119 = arith.constant 0 : index
    %120 = vector.load %arg6[%c0_118, %c0_119] : memref<16x1xf32, #tpu.memory_space<vmem>>, vector<16x1xf32>
    %121 = vector.broadcast %120 : vector<16x1xf32> to vector<16x384xf32>
    %122 = arith.addf %119, %121 : vector<16x384xf32>
    %cst_120 = arith.constant 0.000000e+00 : f32
    %123 = vector.broadcast %cst_120 : f32 to vector<16x384xf32>
    %124 = arith.maximumf %122, %123 : vector<16x384xf32>
    %125 = arith.addf %64, %124 : vector<16x384xf32>
    %126 = vector.broadcast %0 : vector<1x384xf32> to vector<16x384xf32>
    %127 = arith.mulf %125, %126 : vector<16x384xf32>
    %128 = arith.truncf %127 : vector<16x384xf32> to vector<16x384xbf16>
    %c0_121 = arith.constant 0 : index
    %c128_122 = arith.constant 128 : index
    %129 = vector.load %arg10[%c0_121, %c128_122] : memref<16x640xbf16, #tpu.memory_space<vmem>>, vector<16x384xbf16>
    tpu.vector_store %arg10[%c0_121, %c128_122], %128 {strides = array<i32>} : memref<16x640xbf16, #tpu.memory_space<vmem>>, vector<16x384xbf16>,
    %cst_123 = arith.constant 0.000000e+00 : f32
    %130 = vector.broadcast %cst_123 : f32 to vector<8x384xf32>
    %c0_124 = arith.constant 0 : index
    %c0_125 = arith.constant 0 : index
    %c0_126 = arith.constant 0 : index
    %131 = vector.load %arg7[%c0_124, %c0_125, %c0_126] : memref<9x8x16xbf16, #tpu.memory_space<vmem>>, vector<1x8x16xbf16>
    %132 = vector.shape_cast %131 : vector<1x8x16xbf16> to vector<8x16xbf16>
    %c0_127 = arith.constant 0 : index
    %c109_128 = arith.constant 109 : index
    %133 = vector.load %arg10[%c0_127, %c109_128] : memref<16x640xbf16, #tpu.memory_space<vmem>>, vector<16x384xbf16>
    %cst_129 = arith.constant dense<0.000000e+00> : vector<8x384xf32>
    %134 = tpu.matmul %132, %133, %cst_129 {dimension_numbers = #tpu.dot_dimension_numbers<[1], [0], [0], [1], [0, 0, 1, 1], [], []>} : vector<8x16xbf16>, vector<16x384xbf16>, vector<8x384xf32> -> vector<8x384xf32>
    %135 = arith.addf %130, %134 : vector<8x384xf32>
    %c1_130 = arith.constant 1 : index
    %c0_131 = arith.constant 0 : index
    %c0_132 = arith.constant 0 : index
    %136 = vector.load %arg7[%c1_130, %c0_131, %c0_132] : memref<9x8x16xbf16, #tpu.memory_space<vmem>>, vector<1x8x16xbf16>
    %137 = vector.shape_cast %136 : vector<1x8x16xbf16> to vector<8x16xbf16>
    %c0_133 = arith.constant 0 : index
    %c110_134 = arith.constant 110 : index
    %138 = vector.load %arg10[%c0_133, %c110_134] : memref<16x640xbf16, #tpu.memory_space<vmem>>, vector<16x384xbf16>
    %cst_135 = arith.constant dense<0.000000e+00> : vector<8x384xf32>
    %139 = tpu.matmul %137, %138, %cst_135 {dimension_numbers = #tpu.dot_dimension_numbers<[1], [0], [0], [1], [0, 0, 1, 1], [], []>} : vector<8x16xbf16>, vector<16x384xbf16>, vector<8x384xf32> -> vector<8x384xf32>
    %140 = arith.addf %135, %139 : vector<8x384xf32>
    %c2_136 = arith.constant 2 : index
    %c0_137 = arith.constant 0 : index
    %c0_138 = arith.constant 0 : index
    %141 = vector.load %arg7[%c2_136, %c0_137, %c0_138] : memref<9x8x16xbf16, #tpu.memory_space<vmem>>, vector<1x8x16xbf16>
    %142 = vector.shape_cast %141 : vector<1x8x16xbf16> to vector<8x16xbf16>
    %c0_139 = arith.constant 0 : index
    %c111_140 = arith.constant 111 : index
    %143 = vector.load %arg10[%c0_139, %c111_140] : memref<16x640xbf16, #tpu.memory_space<vmem>>, vector<16x384xbf16>
    %cst_141 = arith.constant dense<0.000000e+00> : vector<8x384xf32>
    %144 = tpu.matmul %142, %143, %cst_141 {dimension_numbers = #tpu.dot_dimension_numbers<[1], [0], [0], [1], [0, 0, 1, 1], [], []>} : vector<8x16xbf16>, vector<16x384xbf16>, vector<8x384xf32> -> vector<8x384xf32>
    %145 = arith.addf %140, %144 : vector<8x384xf32>
    %c3_142 = arith.constant 3 : index
    %c0_143 = arith.constant 0 : index
    %c0_144 = arith.constant 0 : index
    %146 = vector.load %arg7[%c3_142, %c0_143, %c0_144] : memref<9x8x16xbf16, #tpu.memory_space<vmem>>, vector<1x8x16xbf16>
    %147 = vector.shape_cast %146 : vector<1x8x16xbf16> to vector<8x16xbf16>
    %c0_145 = arith.constant 0 : index
    %c127_146 = arith.constant 127 : index
    %148 = vector.load %arg10[%c0_145, %c127_146] : memref<16x640xbf16, #tpu.memory_space<vmem>>, vector<16x384xbf16>
    %cst_147 = arith.constant dense<0.000000e+00> : vector<8x384xf32>
    %149 = tpu.matmul %147, %148, %cst_147 {dimension_numbers = #tpu.dot_dimension_numbers<[1], [0], [0], [1], [0, 0, 1, 1], [], []>} : vector<8x16xbf16>, vector<16x384xbf16>, vector<8x384xf32> -> vector<8x384xf32>
    %150 = arith.addf %145, %149 : vector<8x384xf32>
    %c4_148 = arith.constant 4 : index
    %c0_149 = arith.constant 0 : index
    %c0_150 = arith.constant 0 : index
    %151 = vector.load %arg7[%c4_148, %c0_149, %c0_150] : memref<9x8x16xbf16, #tpu.memory_space<vmem>>, vector<1x8x16xbf16>
    %152 = vector.shape_cast %151 : vector<1x8x16xbf16> to vector<8x16xbf16>
    %c0_151 = arith.constant 0 : index
    %c128_152 = arith.constant 128 : index
    %153 = vector.load %arg10[%c0_151, %c128_152] : memref<16x640xbf16, #tpu.memory_space<vmem>>, vector<16x384xbf16>
    %cst_153 = arith.constant dense<0.000000e+00> : vector<8x384xf32>
    %154 = tpu.matmul %152, %153, %cst_153 {dimension_numbers = #tpu.dot_dimension_numbers<[1], [0], [0], [1], [0, 0, 1, 1], [], []>} : vector<8x16xbf16>, vector<16x384xbf16>, vector<8x384xf32> -> vector<8x384xf32>
    %155 = arith.addf %150, %154 : vector<8x384xf32>
    %c5_154 = arith.constant 5 : index
    %c0_155 = arith.constant 0 : index
    %c0_156 = arith.constant 0 : index
    %156 = vector.load %arg7[%c5_154, %c0_155, %c0_156] : memref<9x8x16xbf16, #tpu.memory_space<vmem>>, vector<1x8x16xbf16>
    %157 = vector.shape_cast %156 : vector<1x8x16xbf16> to vector<8x16xbf16>
    %c0_157 = arith.constant 0 : index
    %c129_158 = arith.constant 129 : index
    %158 = vector.load %arg10[%c0_157, %c129_158] : memref<16x640xbf16, #tpu.memory_space<vmem>>, vector<16x384xbf16>
    %cst_159 = arith.constant dense<0.000000e+00> : vector<8x384xf32>
    %159 = tpu.matmul %157, %158, %cst_159 {dimension_numbers = #tpu.dot_dimension_numbers<[1], [0], [0], [1], [0, 0, 1, 1], [], []>} : vector<8x16xbf16>, vector<16x384xbf16>, vector<8x384xf32> -> vector<8x384xf32>
    %160 = arith.addf %155, %159 : vector<8x384xf32>
    %c6_160 = arith.constant 6 : index
    %c0_161 = arith.constant 0 : index
    %c0_162 = arith.constant 0 : index
    %161 = vector.load %arg7[%c6_160, %c0_161, %c0_162] : memref<9x8x16xbf16, #tpu.memory_space<vmem>>, vector<1x8x16xbf16>
    %162 = vector.shape_cast %161 : vector<1x8x16xbf16> to vector<8x16xbf16>
    %c0_163 = arith.constant 0 : index
    %c145_164 = arith.constant 145 : index
    %163 = vector.load %arg10[%c0_163, %c145_164] : memref<16x640xbf16, #tpu.memory_space<vmem>>, vector<16x384xbf16>
    %cst_165 = arith.constant dense<0.000000e+00> : vector<8x384xf32>
    %164 = tpu.matmul %162, %163, %cst_165 {dimension_numbers = #tpu.dot_dimension_numbers<[1], [0], [0], [1], [0, 0, 1, 1], [], []>} : vector<8x16xbf16>, vector<16x384xbf16>, vector<8x384xf32> -> vector<8x384xf32>
    %165 = arith.addf %160, %164 : vector<8x384xf32>
    %c7_166 = arith.constant 7 : index
    %c0_167 = arith.constant 0 : index
    %c0_168 = arith.constant 0 : index
    %166 = vector.load %arg7[%c7_166, %c0_167, %c0_168] : memref<9x8x16xbf16, #tpu.memory_space<vmem>>, vector<1x8x16xbf16>
    %167 = vector.shape_cast %166 : vector<1x8x16xbf16> to vector<8x16xbf16>
    %c0_169 = arith.constant 0 : index
    %c146_170 = arith.constant 146 : index
    %168 = vector.load %arg10[%c0_169, %c146_170] : memref<16x640xbf16, #tpu.memory_space<vmem>>, vector<16x384xbf16>
    %cst_171 = arith.constant dense<0.000000e+00> : vector<8x384xf32>
    %169 = tpu.matmul %167, %168, %cst_171 {dimension_numbers = #tpu.dot_dimension_numbers<[1], [0], [0], [1], [0, 0, 1, 1], [], []>} : vector<8x16xbf16>, vector<16x384xbf16>, vector<8x384xf32> -> vector<8x384xf32>
    %170 = arith.addf %165, %169 : vector<8x384xf32>
    %c8_172 = arith.constant 8 : index
    %c0_173 = arith.constant 0 : index
    %c0_174 = arith.constant 0 : index
    %171 = vector.load %arg7[%c8_172, %c0_173, %c0_174] : memref<9x8x16xbf16, #tpu.memory_space<vmem>>, vector<1x8x16xbf16>
    %172 = vector.shape_cast %171 : vector<1x8x16xbf16> to vector<8x16xbf16>
    %c0_175 = arith.constant 0 : index
    %c147_176 = arith.constant 147 : index
    %173 = vector.load %arg10[%c0_175, %c147_176] : memref<16x640xbf16, #tpu.memory_space<vmem>>, vector<16x384xbf16>
    %cst_177 = arith.constant dense<0.000000e+00> : vector<8x384xf32>
    %174 = tpu.matmul %172, %173, %cst_177 {dimension_numbers = #tpu.dot_dimension_numbers<[1], [0], [0], [1], [0, 0, 1, 1], [], []>} : vector<8x16xbf16>, vector<16x384xbf16>, vector<8x384xf32> -> vector<8x384xf32>
    %175 = arith.addf %170, %174 : vector<8x384xf32>
    %c0_178 = arith.constant 0 : index
    %c0_179 = arith.constant 0 : index
    %176 = vector.load %arg8[%c0_178, %c0_179] : memref<8x1xf32, #tpu.memory_space<vmem>>, vector<8x1xf32>
    %177 = vector.broadcast %176 : vector<8x1xf32> to vector<8x384xf32>
    %178 = arith.addf %175, %177 : vector<8x384xf32>
    %179 = vector.extract_strided_slice %178 {offsets = [0, 0], sizes = [1, 384], strides = [1, 1]} : vector<8x384xf32> to vector<1x384xf32>
    %180 = arith.negf %179 : vector<1x384xf32>
    %181 = math.exp %180 : vector<1x384xf32>
    %cst_180 = arith.constant 1.000000e+00 : f32
    %182 = vector.broadcast %cst_180 : f32 to vector<1x384xf32>
    %183 = arith.addf %182, %181 : vector<1x384xf32>
    %184 = arith.divf %182, %183 : vector<1x384xf32>
    %c0_181 = arith.constant 0 : index
    %c0_182 = arith.constant 0 : index
    %c0_183 = arith.constant 0 : index
    %185 = vector.load %arg9[%c0_181, %c0_182, %c0_183] : memref<1x1x384xf32, #tpu.memory_space<vmem>>, vector<1x1x384xf32>
    %186 = vector.shape_cast %185 : vector<1x1x384xf32> to vector<1x384xf32>
    %187 = vector.shape_cast %184 : vector<1x384xf32> to vector<1x1x384xf32>
    tpu.vector_store %arg9[%c0_181, %c0_182, %c0_183], %187 {strides = array<i32>} : memref<1x1x384xf32, #tpu.memory_space<vmem>>, vector<1x1x384xf32>,
    return
  }
  func.func @transform_0(%arg0: i32) -> (i32, i32) {
    %c0_i32 = arith.constant 0 : i32
    %c0_i32_0 = arith.constant 0 : i32
    %c0_i32_1 = arith.constant 0 : i32
    return %c0_i32, %c0_i32_0 : i32, i32
  }
  func.func @transform_1(%arg0: i32) -> (i32, i32, i32) {
    %c0_i32 = arith.constant 0 : i32
    %c0_i32_0 = arith.constant 0 : i32
    %c0_i32_1 = arith.constant 0 : i32
    return %arg0, %c0_i32, %c0_i32_0 : i32, i32, i32
  }
  func.func @transform_2(%arg0: i32) -> (i32, i32, i32) {
    %c0_i32 = arith.constant 0 : i32
    %c0_i32_0 = arith.constant 0 : i32
    %c0_i32_1 = arith.constant 0 : i32
    %c0_i32_2 = arith.constant 0 : i32
    return %c0_i32, %c0_i32_0, %c0_i32_1 : i32, i32, i32
  }
  func.func @transform_3(%arg0: i32) -> (i32, i32) {
    %c0_i32 = arith.constant 0 : i32
    %c0_i32_0 = arith.constant 0 : i32
    %c0_i32_1 = arith.constant 0 : i32
    return %c0_i32, %c0_i32_0 : i32, i32
  }
  func.func @transform_4(%arg0: i32) -> (i32, i32, i32) {
    %c0_i32 = arith.constant 0 : i32
    %c0_i32_0 = arith.constant 0 : i32
    %c0_i32_1 = arith.constant 0 : i32
    %c0_i32_2 = arith.constant 0 : i32
    return %c0_i32, %c0_i32_0, %c0_i32_1 : i32, i32, i32
  }
  func.func @transform_5(%arg0: i32) -> (i32, i32) {
    %c0_i32 = arith.constant 0 : i32
    %c0_i32_0 = arith.constant 0 : i32
    %c0_i32_1 = arith.constant 0 : i32
    return %c0_i32, %c0_i32_0 : i32, i32
  }
  func.func @transform_6(%arg0: i32) -> (i32, i32, i32) {
    %c0_i32 = arith.constant 0 : i32
    %c0_i32_0 = arith.constant 0 : i32
    %c0_i32_1 = arith.constant 0 : i32
    %c0_i32_2 = arith.constant 0 : i32
    return %c0_i32, %c0_i32_0, %c0_i32_1 : i32, i32, i32
  }
  func.func @transform_7(%arg0: i32) -> (i32, i32) {
    %c0_i32 = arith.constant 0 : i32
    %c0_i32_0 = arith.constant 0 : i32
    %c0_i32_1 = arith.constant 0 : i32
    return %c0_i32, %c0_i32_0 : i32, i32
  }
  func.func @transform_8(%arg0: i32) -> (i32, i32, i32) {
    %c0_i32 = arith.constant 0 : i32
    %c0_i32_0 = arith.constant 0 : i32
    %c0_i32_1 = arith.constant 0 : i32
    return %arg0, %c0_i32, %c0_i32_0 : i32, i32, i32
  }
}

</mosaic_0001>

<bundles_post_ra>
// kernel: squeeze.1
= control target key start
LH: loop header
LB: loop body
LE: loop exit
PB: predicated region body
PF: predicated region fallthrough
CT: control target
= control target key end

     0   :  { %s127_s12 = smov 3  ;;  %s19_s13 = smov 3  ;;  %vm16_vm0 = vcmask 146432   ;;  %vm132_vm1 = vcmask 1014784   ;;  %vm145_vm2 = vcmask 1031168   ;;  %vm136_vm3 = vcmask 31744   ;;  %s306_s0 = inlined_call_operand.vmem [shape: f32[2,324], index: 0, kind: input, shape index: {}]   ;;  %s307_s1 = inlined_call_operand.vmem [shape: f32[2,18,18], index: 1, kind: output, shape index: {}]  }
   0x1   :  { %v13_v0 = vld [vmem:[%s306_s0] sm:$0x3]  ;;  %v156_v1 = vld [vmem:[%s306_s0 + $0x4] sm:$0x3]  ;;  %v157_v2 = vld [vmem:[%s306_s0 + $0x2] sm:$0x3] }
   0x2   :  { %14 = vst [vmem:[#allocation0] sm:$0x3] %v13_v0  ;;  %8 = vst [vmem:[#allocation0 + $0x10] sm:$0x3] %v156_v1  ;;  %s130_s0 = smov 3  ;;  %s27_s14 = smov 3 }
   0x3   :  { %12 = vst [vmem:[#allocation0 + $0x8] sm:$0x3] %v157_v2  ;;  %s194_s15 = smov 110   ;;  %s195_s18 = smov 114   ;;  %vm139_vm4 = vcmask 146464   ;;  %vm149_vm5 = vcmask 15360  }
   0x4   :  { %s41_s19 = smov 3  ;;  %s196_s20 = smov 4   ;;  %vm152_vm6 = vcmask 146448  }
   0x5   :  { %s197_s21 = smov 112   ;;  %s49_s22 = smov 3 }
   0x6   :  { %s198_s23 = smov 2   ;;  %s199_s24 = smov 96  }
   0x7   :  { %s63_s25 = smov 3  ;;  %s71_s26 = smov 3 }
   0x8   :  { %s200_s27 = smov 94   ;;  %s201_s28 = smov 92  }
   0x9   :  { %v34_v3 = vld [vmem:[#allocation0] sm:$0x3]   ;;  %v131_v5 = vld [vmem:[#allocation0 + $0x11] ss:$-1 sm:%s130_s0]   ;;  %s85_s29 = smov 3  ;;  %s202_s30 = smov 78  }
   0xa   :  { %v15_v4 = vld [vmem:[#allocation0] sm:$0x3]   ;;  %35 = vrot.lane.b32.xlu0 %v34_v3, %s194_s15  ;;  %v128_v6 = vld [vmem:[#allocation0 + $0x9] ss:$-1 sm:%s127_s12]   ;;  %v20_v7 = vld [vmem:[#allocation0 + $0x11] ss:$-1 sm:%s19_s13]  }
   0xb   :  { %17 = vst.msk [vmem:[%s307_s1] ss:$24 sm:$0x3] %vm16_vm0, %v15_v4   ;;  %v133_v8 = vsel %vm132_vm1, %v131_v5, %v128_v6  ;;  %21 = vrot.lane.b32.xlu1 %v20_v7, %s195_s18  ;;  %v142_v9 = vld [vmem:[#allocation0] sm:$0x3]   ;;  %s203_s2 = smov 76  }
   0xc   :  { %v144_v10 = vld [vmem:[#allocation0 + $0x8] sm:$0x3]   ;;  %v42_v13 = vld [vmem:[#allocation0 + $0x11] ss:$-1 sm:%s41_s19]   ;;  %v56_v15 = vld [vmem:[#allocation0] sm:$0x3]  }
   0xd   :  { %v28_v11 = vld [vmem:[#allocation0 + $0x9] ss:$-1 sm:%s27_s14]   ;;  %v146_v12 = vsel %vm145_vm2, %v144_v10, %v142_v9  ;;  %v64_v16 = vld [vmem:[#allocation0 + $0x11] ss:$-1 sm:%s63_s25]   ;;  %v78_v18 = vld [vmem:[#allocation0] sm:$0x3]  }
   0xe   :  { %134 = vrot.lane.b32.xlu0 %v133_v8, %s196_s20  ;;  %v50_v14 = vld [vmem:[#allocation0 + $0x9] ss:$-1 sm:%s49_s22]   ;;  %s99_s3 = smov 3  ;;  %s204_s4 = smov 74   ;;  %v92_v20 = vld [vmem:[#allocation0] sm:$0x3]  }
   0xf   :  { %29 = vrot.lane.b32.xlu1 %v28_v11, %s197_s21  ;;  %v72_v17 = vld [vmem:[#allocation0 + $0x9] ss:$-1 sm:%s71_s26]   ;;  %s205_s5 = smov 58   ;;  %s113_s6 = smov 3  ;;  %v106_v22 = vld [vmem:[#allocation0] sm:$0x3]  }
  0x10   :  { %v86_v19 = vld [vmem:[#allocation0 + $0x9] ss:$-1 sm:%s85_s29]   ;;  %s206_s7 = smov 56   ;;  %s207_s8 = smov 40   ;;  %v120_v24 = vld [vmem:[#allocation0] sm:$0x3]  }
  0x11   :  { %v100_v21 = vld [vmem:[#allocation0 + $0x9] ss:$-1 sm:%s99_s3]   ;;  %s208_s9 = smov 38   ;;  %s209_s10 = smov 22  }
  0x12   :  { %147 = vrot.lane.b32.xlu0 %v146_v12, %s198_s23  ;;  %v114_v23 = vld [vmem:[#allocation0 + $0x9] ss:$-1 sm:%s113_s6]   ;;  %s210_s11 = smov 20  }
  0x13   :  { %43 = vrot.lane.b32.xlu1 %v42_v13, %s199_s24 }
  0x16   :  { %51 = vrot.lane.b32.xlu0 %v50_v14, %s200_s27 }
  0x17   :  { %57 = vrot.lane.b32.xlu1 %v56_v15, %s201_s28 }
  0x1a   :  { %65 = vrot.lane.b32.xlu0 %v64_v16, %s202_s30 }
  0x1b   :  { %73 = vrot.lane.b32.xlu1 %v72_v17, %s203_s2 }
  0x1e   :  { %79 = vrot.lane.b32.xlu0 %v78_v18, %s204_s4 }
  0x1f   :  { %87 = vrot.lane.b32.xlu1 %v86_v19, %s205_s5 }
  0x22   :  { %93 = vrot.lane.b32.xlu0 %v92_v20, %s206_s7 }
  0x23   :  { %101 = vrot.lane.b32.xlu1 %v100_v21, %s207_s8 }
  0x26   :  { %107 = vrot.lane.b32.xlu0 %v106_v22, %s208_s9 }
  0x27   :  { %115 = vrot.lane.b32.xlu1 %v114_v23, %s209_s10 }
  0x2a   :  { %121 = vrot.lane.b32.xlu0 %v120_v24, %s210_s11 }
  0x7c   :  { %v36_v25 = vpop.permute.xlu0 %35  }
  0x7d   :  { %160 = vst.msk [vmem:[%s307_s1 + $0x1] ss:$24 sm:$0x3] %vm16_vm0, %v36_v25   ;;  %v22_v26 = vpop.permute.xlu1 %21  }
  0x7e   :  { %158 = vst.msk [vmem:[%s307_s1 + $0x27] ss:$-24 sm:$0x3] %vm16_vm0, %v22_v26  }
  0x80   :  { %v135_v27 = vpop.permute.xlu0 %134  }
  0x81   :  { %173 = vst.msk [vmem:[%s307_s1 + $0x26] ss:$-24 sm:$0x3] %vm136_vm3, %v135_v27   ;;  %v30_v28 = vpop.permute.xlu1 %29  }
  0x82   :  { %174 = vst.msk [vmem:[%s307_s1 + $0x26] ss:$-24 sm:$0x3] %vm139_vm4, %v135_v27  }
  0x83   :  { %159 = vst.msk [vmem:[%s307_s1 + $0x20] ss:$-24 sm:$0x3] %vm16_vm0, %v30_v28  }
  0x84   :  { %v148_v29 = vpop.permute.xlu0 %147  }
  0x85   :  { %175 = vst.msk [vmem:[%s307_s1 + $0x7] ss:$24 sm:$0x3] %vm149_vm5, %v148_v29   ;;  %v44_v30 = vpop.permute.xlu1 %43  }
  0x86   :  { %176 = vst.msk [vmem:[%s307_s1 + $0x7] ss:$24 sm:$0x3] %vm152_vm6, %v148_v29  }
  0x87   :  { %161 = vst.msk [vmem:[%s307_s1 + $0x28] ss:$-24 sm:$0x3] %vm16_vm0, %v44_v30  }
  0x88   :  { %v52_v31 = vpop.permute.xlu0 %51  }
  0x89   :  { %162 = vst.msk [vmem:[%s307_s1 + $0x21] ss:$-24 sm:$0x3] %vm16_vm0, %v52_v31   ;;  %v58_v32 = vpop.permute.xlu1 %57  }
  0x8a   :  { %163 = vst.msk [vmem:[%s307_s1 + $0x2] ss:$24 sm:$0x3] %vm16_vm0, %v58_v32  }
  0x8c   :  { %v66_v33 = vpop.permute.xlu0 %65  }
  0x8d   :  { %164 = vst.msk [vmem:[%s307_s1 + $0x29] ss:$-24 sm:$0x3] %vm16_vm0, %v66_v33   ;;  %v74_v34 = vpop.permute.xlu1 %73  }
  0x8e   :  { %165 = vst.msk [vmem:[%s307_s1 + $0x22] ss:$-24 sm:$0x3] %vm16_vm0, %v74_v34  }
  0x90   :  { %v80_v35 = vpop.permute.xlu0 %79  }
  0x91   :  { %166 = vst.msk [vmem:[%s307_s1 + $0x3] ss:$24 sm:$0x3] %vm16_vm0, %v80_v35   ;;  %v88_v36 = vpop.permute.xlu1 %87  }
  0x92   :  { %167 = vst.msk [vmem:[%s307_s1 + $0x23] ss:$-24 sm:$0x3] %vm16_vm0, %v88_v36  }
  0x94   :  { %v94_v37 = vpop.permute.xlu0 %93  }
  0x95   :  { %168 = vst.msk [vmem:[%s307_s1 + $0x4] ss:$24 sm:$0x3] %vm16_vm0, %v94_v37   ;;  %v102_v38 = vpop.permute.xlu1 %101  }
  0x96   :  { %169 = vst.msk [vmem:[%s307_s1 + $0x24] ss:$-24 sm:$0x3] %vm16_vm0, %v102_v38  }
  0x98   :  { %v108_v39 = vpop.permute.xlu0 %107  }
  0x99   :  { %170 = vst.msk [vmem:[%s307_s1 + $0x5] ss:$24 sm:$0x3] %vm16_vm0, %v108_v39   ;;  %v116_v40 = vpop.permute.xlu1 %115  }
  0x9a   :  { %171 = vst.msk [vmem:[%s307_s1 + $0x25] ss:$-24 sm:$0x3] %vm16_vm0, %v116_v40  }
  0x9c   :  { %v122_v41 = vpop.permute.xlu0 %121  }
  0x9d   :  { %172 = vst.msk [vmem:[%s307_s1 + $0x6] ss:$24 sm:$0x3] %vm16_vm0, %v122_v41  }

// kernel: attention_forward.1
= control target key start
LH: loop header
LB: loop body
LE: loop exit
PB: predicated region body
PF: predicated region fallthrough
CT: control target
= control target key end

     0   :  { %s4139_s27 = smov 0   ;;  %s4774_s0 = inlined_call_operand.vmem [shape: f32[1,384], index: 0, kind: input, shape index: {}]   ;;  %s4775_s1 = inlined_call_operand.vmem [shape: bf16[2,32,640], index: 1, kind: input, shape index: {}]   ;;  %s4776_s2 = inlined_call_operand.vmem [shape: bf16[9,16,16], index: 2, kind: input, shape index: {}]   ;;  %s4777_s3 = inlined_call_operand.vmem [shape: f32[16,1], index: 3, kind: input, shape index: {}]   ;;  %s4778_s4 = inlined_call_operand.vmem [shape: bf16[9,16,16], index: 4, kind: input, shape index: {}]   ;;  %s4779_s5 = inlined_call_operand.vmem [shape: f32[16,1], index: 5, kind: input, shape index: {}]   ;;  %s4780_s6 = inlined_call_operand.vmem [shape: bf16[9,8,16], index: 6, kind: input, shape index: {}]   ;;  %s4781_s7 = inlined_call_operand.vmem [shape: f32[8,1], index: 7, kind: input, shape index: {}]   ;;  %s4782_s8 = inlined_call_operand.vmem [shape: f32[2,1,384], index: 8, kind: output, shape index: {}]  }
   0x1 LB: > { %s3569_s28 = sadd.s32 4294967295, %s4080_s27   ;;  %p3573_p0 = scmp.ge.s32.totalorder %s4080_s27, 1  ;;  %s4080_s27 = sphi %s4139_s27, %s18_s27  }
   0x2   : > { %p262_p1 = scmp.lt.s32.totalorder %s4080_s27, 3 }
   0x4   : > { %p263_p2 = pnand %p3573_p0, %p262_p1 }
   0x5   : > { %p295_p3 = scmp.lt.s32.totalorder (!%p263_p2), %s3569_s28, 1  ;;  %v4082_v0 = vmov (!%p263_p2), 0   ;;  %s4083_s11 = smov (!%p263_p2), 18   ;;  %v4086_v4 = vmov (!%p263_p2), 0.0   ;;  %vm4088_vm0 = vmmov (!%p263_p2), 0   ;;  %vm346_vm1 = vcmask (!%p263_p2), 146432  }
   0x6   : > { %266 = sbr.rel (%p263_p2) target bundleno = 1005 (0x3ed), region = 52  ;;  %389 = vmatprep.mubr.bf16.mxu0 (!%p263_p2), %v4082_v0  ;;  %4016 = vset.pattern.permute.xlu0 (!%p263_p2), %v4082_v0  ;;  %s4084_s12 = smov (!%p263_p2), 19   ;;  %vm454_vm2 = vcmask (!%p263_p2), 154624   ;;  %v4036_v24 = vld [vmem:[%s4776_s2 + $0x8] sm:$0xff] (!%p263_p2)   ;;  %vm353_vm3 = vcmask (!%p263_p2), 130048   ;;  %vm564_vm4 = vcmask (!%p263_p2), 138240  }
   0x7   : > { %4017 = vset.pattern.permute.xlu1 (!%p263_p2), %v4082_v0  ;;  %s4085_s13 = smov (!%p263_p2), 17   ;;  %3768 = vmatprep.subr.bf16.mxu1 (!%p263_p2), %v4086_v4  ;;  %s4087_s14 = smov (!%p263_p2), 1   ;;  %vm680_vm5 = vcmask (!%p263_p2), 7168   ;;  %v4042_v34 = vld [vmem:[%s4776_s2] sm:$0xff] (!%p263_p2)   ;;  %v4044_v44 = vld [vmem:[%s4776_s2 + $0x10] sm:$0xff] (!%p263_p2)   ;;  %vm937_vm6 = vcmask (!%p263_p2), 1039360  }
   0x8   : > { %3770 = vmatprep.mubr.msk.bf16.mxu1 (!%p263_p2), %vm4088_vm0, %v4086_v4  ;;  %s4089_s15 = smov (!%p263_p2), 127   ;;  %s4090_s16 = smov (!%p263_p2), 111   ;;  %v4045_v54 = vld [vmem:[%s4776_s2 + $0x18] sm:$0xff] (!%p263_p2)   ;;  %v1385_v58 = vld [vmem:[%s4777_s3] sm:$0xff] (!%p263_p2)  ;;  %v1386_v59 = vld [vmem:[%s4777_s3 + $0x8] sm:$0xff] (!%p263_p2)  ;;  %vm1053_vm7 = vcmask (!%p263_p2), 908288  }
   0x9   : > { %s4091_s17 = smov (!%p263_p2), 110   ;;  %s4092_s18 = smov (!%p263_p2), 109   ;;  %vm1169_vm8 = vcmask (!%p263_p2), 900096   ;;  %vm1285_vm9 = vcmask (!%p263_p2), 891904  }
   0xd   : > { %s4784_s28 = smov (!%p295_p3, %s3569_s28), 1 }
   0xe   : > { %s3994_s29 = smul.u32 80, %s4784_s28 }
  0x10   : > { %s4155_s10 = scalar_lea.vmem %s4775_s1, %s3994_s29 }
  0x11   : > { %v4018_v1 = vld [vmem:[%s4155_s10 + $0x4] ss:$20 sps:$4 sm:$0xff]   ;;  %v4020_v2 = vld [vmem:[%s4155_s10] ss:$20 sps:$4 sm:$0xff]   ;;  %v4021_v3 = vld [vmem:[%s4155_s10 + $0x8] ss:$20 sps:$4 sm:$0xff]  }
  0x12   : > { %340 = vrot.lane.b32.xlu0 %v4018_v1, %s4083_s11  ;;  %338 = vrot.lane.b32.xlu1 %v4020_v2, %s4083_s11  ;;  %v4176_v5 = vld [vmem:[%s4155_s10 + $0x8] ss:$20 sps:$4 sm:$0xff]   ;;  %v4025_v6 = vld [vmem:[%s4155_s10 + $0xc] ss:$20 sps:$4 sm:$0xff]  }
  0x13   : > { %v4183_v7 = vld [vmem:[%s4155_s10 + $0x4] ss:$20 sps:$4 sm:$0xff]   ;;  %v4028_v8 = vld [vmem:[%s4155_s10 + $0xc] ss:$20 sps:$4 sm:$0xff]   ;;  %v4034_v11 = vld [vmem:[%s4155_s10 + $0x28] ss:$20 sps:$4 sm:$0xff]  }
  0x14   : > { %v4032_v9 = vld [vmem:[%s4155_s10 + $0x2c] ss:$20 sps:$4 sm:$0xff]   ;;  %v4029_v10 = vld [vmem:[%s4155_s10 + $0x30] ss:$20 sps:$4 sm:$0xff]   ;;  %v4035_v13 = vld [vmem:[%s4155_s10 + $0x34] ss:$20 sps:$4 sm:$0xff]  }
  0x15   : > { %v4031_v12 = vld [vmem:[%s4155_s10 + $0x10] ss:$20 sps:$4 sm:$0xff]   ;;  %v4040_v15 = vld [vmem:[%s4155_s10 + $0x34] ss:$20 sps:$4 sm:$0xff]   ;;  %v4240_v16 = vld [vmem:[%s4155_s10 + $0x2c] ss:$20 sps:$4 sm:$0xff]  }
  0x16   : > { %342 = vrot.lane.b32.xlu0 %v4021_v3, %s4083_s11  ;;  %448 = vrot.lane.b32.xlu1 %v4018_v1, %s4084_s12  ;;  %v4233_v14 = vld [vmem:[%s4155_s10 + $0x30] ss:$20 sps:$4 sm:$0xff]   ;;  %v4043_v17 = vld [vmem:[%s4155_s10 + $0x38] ss:$20 sps:$4 sm:$0xff]  }
  0x1a   : > { %450 = vrot.lane.b32.xlu0 %v4021_v3, %s4084_s12  ;;  %446 = vrot.lane.b32.xlu1 %v4020_v2, %s4084_s12 }
  0x1e   : > { %558 = vrot.lane.b32.xlu0 %v4018_v1, %s4085_s13  ;;  %560 = vrot.lane.b32.xlu1 %v4021_v3, %s4085_s13 }
  0x22   : > { %556 = vrot.lane.b32.xlu0 %v4020_v2, %s4085_s13  ;;  %674 = vrot.lane.b32.xlu1 %v4018_v1, %s4087_s14 }
  0x26   : > { %676 = vrot.lane.b32.xlu0 %v4021_v3, %s4087_s14  ;;  %672 = vrot.lane.b32.xlu1 %v4020_v2, %s4087_s14  ;;  %v4046_v2 = vld [vmem:[%s4776_s2 + $0x20] sm:$0xff]  }
  0x27   : > { %v4047_v3 = vld [vmem:[%s4155_s10 + $0xc] ss:$20 sps:$4 sm:$0xff]  }
  0x2a   : > { %931 = vrot.lane.b32.xlu0 %v4176_v5, %s4089_s15  ;;  %933 = vrot.lane.b32.xlu1 %v4025_v6, %s4089_s15 }
  0x2e   : > { %929 = vrot.lane.b32.xlu0 %v4183_v7, %s4089_s15  ;;  %344 = vrot.lane.b32.xlu1 %v4028_v8, %s4083_s11 }
  0x32   : > { %1047 = vrot.lane.b32.xlu0 %v4176_v5, %s4090_s16  ;;  %1049 = vrot.lane.b32.xlu1 %v4025_v6, %s4090_s16 }
  0x36   : > { %1045 = vrot.lane.b32.xlu0 %v4183_v7, %s4090_s16  ;;  %452 = vrot.lane.b32.xlu1 %v4028_v8, %s4084_s12 }
  0x3a   : > { %562 = vrot.lane.b32.xlu0 %v4028_v8, %s4085_s13  ;;  %1163 = vrot.lane.b32.xlu1 %v4176_v5, %s4091_s17 }
  0x3e   : > { %1165 = vrot.lane.b32.xlu0 %v4025_v6, %s4091_s17  ;;  %1161 = vrot.lane.b32.xlu1 %v4183_v7, %s4091_s17 }
  0x42   : > { %678 = vrot.lane.b32.xlu0 %v4028_v8, %s4087_s14  ;;  %1279 = vrot.lane.b32.xlu1 %v4176_v5, %s4092_s18 }
  0x46   : > { %1281 = vrot.lane.b32.xlu0 %v4025_v6, %s4092_s18  ;;  %1277 = vrot.lane.b32.xlu1 %v4183_v7, %s4092_s18 }
  0x4a   : > { %1441 = vrot.lane.b32.xlu0 %v4032_v9, %s4083_s11  ;;  %1443 = vrot.lane.b32.xlu1 %v4029_v10, %s4083_s11 }
  0x4e   : > { %1439 = vrot.lane.b32.xlu0 %v4034_v11, %s4083_s11  ;;  %935 = vrot.lane.b32.xlu1 %v4031_v12, %s4089_s15 }
  0x52   : > { %1051 = vrot.lane.b32.xlu0 %v4031_v12, %s4090_s16  ;;  %1547 = vrot.lane.b32.xlu1 %v4032_v9, %s4084_s12 }
  0x56   : > { %1549 = vrot.lane.b32.xlu0 %v4029_v10, %s4084_s12  ;;  %1545 = vrot.lane.b32.xlu1 %v4034_v11, %s4084_s12 }
  0x5a   : > { %1167 = vrot.lane.b32.xlu0 %v4031_v12, %s4091_s17  ;;  %1656 = vrot.lane.b32.xlu1 %v4032_v9, %s4085_s13 }
  0x5e   : > { %1658 = vrot.lane.b32.xlu0 %v4029_v10, %s4085_s13  ;;  %1654 = vrot.lane.b32.xlu1 %v4034_v11, %s4085_s13 }
  0x62   : > { %1283 = vrot.lane.b32.xlu0 %v4031_v12, %s4092_s18  ;;  %1445 = vrot.lane.b32.xlu1 %v4035_v13, %s4083_s11 }
  0x66   : > { %1771 = vrot.lane.b32.xlu0 %v4032_v9, %s4087_s14  ;;  %1773 = vrot.lane.b32.xlu1 %v4029_v10, %s4087_s14 }
  0x6a   : > { %1769 = vrot.lane.b32.xlu0 %v4034_v11, %s4087_s14  ;;  %1551 = vrot.lane.b32.xlu1 %v4035_v13, %s4084_s12 }
  0x6e   : > { %1660 = vrot.lane.b32.xlu0 %v4035_v13, %s4085_s13  ;;  %1775 = vrot.lane.b32.xlu1 %v4035_v13, %s4087_s14 }
  0x72   : > { %2027 = vrot.lane.b32.xlu0 %v4233_v14, %s4089_s15  ;;  %2029 = vrot.lane.b32.xlu1 %v4040_v15, %s4089_s15 }
  0x76   : > { %2025 = vrot.lane.b32.xlu0 %v4240_v16, %s4089_s15  ;;  %2142 = vrot.lane.b32.xlu1 %v4233_v14, %s4090_s16 }
  0x7a   : > { %2144 = vrot.lane.b32.xlu0 %v4040_v15, %s4090_s16  ;;  %2140 = vrot.lane.b32.xlu1 %v4240_v16, %s4090_s16 }
  0x7e   : > { %2031 = vrot.lane.b32.xlu0 %v4043_v17, %s4089_s15  ;;  %2146 = vrot.lane.b32.xlu1 %v4043_v17, %s4090_s16 }
  0x82   : > { %2257 = vrot.lane.b32.xlu0 %v4233_v14, %s4091_s17  ;;  %2259 = vrot.lane.b32.xlu1 %v4040_v15, %s4091_s17 }
  0x84   : > { %v341_v18 = vpop.permute.xlu0 %340  ;;  %v339_v19 = vpop.permute.xlu1 %338 }
  0x85   : > { %v347_v23 = vsel %vm346_vm1, %v339_v19, %v341_v18 }
  0x86   : > { %2255 = vrot.lane.b32.xlu0 %v4240_v16, %s4091_s17  ;;  %2261 = vrot.lane.b32.xlu1 %v4043_v17, %s4091_s17 }
  0x88   : > { %v343_v20 = vpop.permute.xlu0 %342  ;;  %v449_v21 = vpop.permute.xlu1 %448 }
  0x89   : > { %v348_v22 = vsel %vm346_vm1, %v341_v18, %v343_v20 }
  0x8a   : > { %357 = vmatprep.subr.bf16.mxu0 %v348_v22  ;;  %2372 = vrot.lane.b32.xlu0 %v4233_v14, %s4092_s18 }
  0x8b   : > { %358 = vmatpush1.bf16.msra.mxu0 %v347_v23  ;;  %2374 = vrot.lane.b32.xlu1 %v4040_v15, %s4092_s18  ;;  %v4048_v15 = vld [vmem:[%s4776_s2 + $0x28] sm:$0xff]  }
  0x8c   : > { %v451_v25 = vpop.permute.xlu0 %450  ;;  %v447_v26 = vpop.permute.xlu1 %446 }
  0x8d   : > { %v456_v27 = vsel %vm454_vm2, %v449_v21, %v451_v25  ;;  %v455_v28 = vsel %vm454_vm2, %v447_v26, %v449_v21 }
  0x8e   : > { %3582 = vmatmul.mubr.msk.bf16.vlgmr.msra.gmra.mrb[0].mxu0 %vm353_vm3, %v4036_v24  ;;  %464 = vmatprep.subr.bf16.mxu0 %v456_v27 }
  0x8f   : > { %465 = vmatpush1.bf16.msra.mxu0 %v455_v28  ;;  %496 = vmatprep.mubr.bf16.mxu0 %v4082_v0 }
  0x90   : > { %v559_v29 = vpop.permute.xlu0 %558  ;;  %2376 = vrot.lane.b32.xlu1 %v4043_v17, %s4092_s18  ;;  %2370 = vrot.lane.b32.xlu0 %v4240_v16, %s4092_s18  ;;  %v561_v30 = vpop.permute.xlu1 %560 }
  0x91   : > { %v566_v31 = vsel %vm564_vm4, %v559_v29, %v561_v30 }
  0x92   : > { %574 = vmatprep.subr.bf16.mxu0 %v566_v31  ;;  %v2478_v31 = vld [vmem:[%s4779_s5 + $0x8] sm:$0xff] }
  0x94   : > { %v557_v32 = vpop.permute.xlu0 %556  ;;  %v675_v33 = vpop.permute.xlu1 %674  ;;  %1389 = vperm.xlu0 %4016, %v1385_v58   ;;  %1394 = vperm.xlu1 %4017, %v1386_v59  }
  0x95   : > { %v565_v35 = vsel %vm564_vm4, %v557_v32, %v559_v29 }
  0x98   : > { %v677_v36 = vpop.permute.xlu0 %676  ;;  %v673_v37 = vpop.permute.xlu1 %672  ;;  %2486 = vperm.xlu0 %4016, %v2478_v31  }
  0x99   : > { %v682_v38 = vsel %vm680_vm5, %v675_v33, %v677_v36  ;;  %v681_v45 = vsel %vm680_vm5, %v673_v37, %v675_v33  ;;  %v4050_v33 = vld [vmem:[%s4776_s2 + $0x38] sm:$0xff]  }
  0x9a   : > { %3585 = vmatmul.mubr.msk.bf16.vlgmr.msra.gmra.mrb[0].mxu0 %vm353_vm3, %v4042_v34 }
  0x9b   : > { %575 = vmatpush1.bf16.msra.mxu0 %v565_v35  ;;  %606 = vmatprep.mubr.bf16.mxu0 %v4082_v0 }
  0x9c   : > { %v932_v39 = vpop.permute.xlu0 %931  ;;  %690 = vmatprep.subr.bf16.mxu0 %v682_v38  ;;  %v4282_v40 = vpop.permute.xlu1 %933  ;;  %v4051_v38 = vld [vmem:[%s4776_s2 + $0x40] sm:$0xff]  }
  0x9d   : > { %v939_v57 = vsel %vm937_vm6, %v932_v39, %v4282_v40 }
  0xa0   : > { %v930_v41 = vpop.permute.xlu0 %929  ;;  %v345_v42 = vpop.permute.xlu1 %344 }
  0xa1   : > { %v349_v43 = vsel %vm346_vm1, %v343_v20, %v345_v42 }
  0xa2   : > { %3769 = vmatpush3.bf16.msra.mxu1 %v349_v43  ;;  %v4052_v43 = vld [vmem:[%s4778_s4 + $0x8] sm:$0xff]  }
  0xa3   : > { %3774 = vmatprep.subr.bf16.mxu1 %v4086_v4 }
  0xa4   : > { %v4289_v46 = vpop.permute.xlu0 %1047  ;;  %v4292_v47 = vpop.permute.xlu1 %1049 }
  0xa5   : > { %3771 = vmatmul.mubr.msk.bf16.vlgmr.msra.gmra.mrb[0].mxu1 %vm353_vm3, %v4036_v24  ;;  %v1055_v8 = vsel %vm1053_vm7, %v4289_v46, %v4292_v47  ;;  %v4049_v24 = vld [vmem:[%s4776_s2 + $0x30] sm:$0xff]  }
  0xa6   : > { %3590 = vmatmul.mubr.msk.bf16.vlgmr.msra.gmra.mrb[0].mxu0 %vm353_vm3, %v4044_v44  ;;  %3776 = vmatprep.mubr.msk.bf16.mxu1 %vm4088_vm0, %v4086_v4 }
  0xa7   : > { %691 = vmatpush1.bf16.msra.mxu0 %v681_v45  ;;  %722 = vmatprep.mubr.bf16.mxu0 %v4082_v0 }
  0xa8   : > { %v1046_v48 = vpop.permute.xlu0 %1045  ;;  %811 = vmatprep.subr.bf16.mxu0 %v4176_v5  ;;  %v453_v49 = vpop.permute.xlu1 %452  ;;  %v938_v5 = vsel %vm937_vm6, %v930_v41, %v932_v39 }
  0xa9   : > { %v457_v50 = vsel %vm454_vm2, %v451_v25, %v453_v49  ;;  %v1054_v17 = vsel %vm1053_vm7, %v1046_v48, %v4289_v46  ;;  %v4053_v49 = vld [vmem:[%s4778_s4] sm:$0xff]  }
  0xaa   : > { %3775 = vmatpush3.bf16.msra.mxu1 %v457_v50 }
  0xab   : > { %3780 = vmatprep.subr.bf16.mxu1 %v4086_v4 }
  0xac   : > { %v563_v51 = vpop.permute.xlu0 %562  ;;  %v4303_v53 = vpop.permute.xlu1 %1163 }
  0xad   : > { %v567_v52 = vsel %vm564_vm4, %v561_v30, %v563_v51  ;;  %3777 = vmatmul.mubr.msk.bf16.vlgmr.msra.gmra.mrb[4].mxu1 %vm353_vm3, %v4042_v34  ;;  %v2477_v30 = vld [vmem:[%s4779_s5] sm:$0xff] }
  0xae   : > { %3781 = vmatpush3.bf16.msra.mxu1 %v567_v52  ;;  %3782 = vmatprep.mubr.msk.bf16.mxu1 %vm4088_vm0, %v4086_v4 }
  0xaf   : > { %3786 = vmatprep.subr.bf16.mxu1 %v4086_v4  ;;  %2481 = vperm.xlu1 %4017, %v2477_v30  }
  0xb0   : > { %v4311_v55 = vpop.permute.xlu0 %1165  ;;  %v4314_v56 = vpop.permute.xlu1 %1161 }
  0xb1   : > { %v1171_v19 = vsel %vm1169_vm8, %v4303_v53, %v4311_v55  ;;  %v1170_v26 = vsel %vm1169_vm8, %v4314_v56, %v4303_v53  ;;  %v4054_v56 = vld [vmem:[%s4778_s4 + $0x10] sm:$0xff]  }
  0xb2   : > { %3595 = vmatmul.mubr.msk.bf16.vlgmr.msra.gmra.mrb[0].mxu0 %vm353_vm3, %v4045_v54 }
  0xb3   : > { %812 = vmatpush1.bf16.msra.mxu0 %v4183_v7  ;;  %843 = vmatprep.mubr.bf16.mxu0 %v4082_v0 }
  0xb4   : > { %v679_v60 = vpop.permute.xlu0 %678  ;;  %947 = vmatprep.subr.bf16.mxu0 %v939_v57  ;;  %v4328_v62 = vpop.permute.xlu1 %1279 }
  0xb5   : > { %v683_v61 = vsel %vm680_vm5, %v677_v36, %v679_v60  ;;  %3783 = vmatmul.mubr.msk.bf16.vlgmr.msra.gmra.mrb[8].mxu1 %vm353_vm3, %v4044_v44 }
  0xb6   : > { %3787 = vmatpush3.bf16.msra.mxu1 %v683_v61  ;;  %3788 = vmatprep.mubr.msk.bf16.mxu1 %vm4088_vm0, %v4086_v4 }
  0xb7   : > { %3792 = vmatprep.subr.bf16.mxu1 %v4086_v4 }
  0xb8   : > { %v4333_v63 = vpop.permute.xlu0 %1281  ;;  %v4336_v1 = vpop.permute.xlu1 %1277 }
  0xb9   : > { %v1287_v28 = vsel %vm1285_vm9, %v4328_v62, %v4333_v63  ;;  %v1286_v36 = vsel %vm1285_vm9, %v4336_v1, %v4328_v62  ;;  %v4055_v62 = vld [vmem:[%s4778_s4 + $0x18] sm:$0xff]  }
  0xbc   : > { %v4343_v6 = vpop.permute.xlu0 %1441  ;;  %v4345_v7 = vpop.permute.xlu1 %1443 }
  0xbd   : > { %3789 = vmatmul.mubr.msk.bf16.vlgmr.msra.gmra.mrb[12].mxu1 %vm353_vm3, %v4045_v54  ;;  %v1448_v37 = vsel %vm346_vm1, %v4343_v6, %v4345_v7 }
  0xbe   : > { %3603 = vmatmul.mubr.msk.bf16.vlgmr.msra.gmra.mrb[0].mxu0 %vm353_vm3, %v4046_v2  ;;  %3793 = vmatpush3.bf16.msra.mxu1 %v4047_v3 }
  0xbf   : > { %948 = vmatpush1.bf16.msra.mxu0 %v938_v5  ;;  %3794 = vmatprep.mubr.msk.bf16.mxu1 %vm4088_vm0, %v4086_v4 }
  0xc0   : > { %3798 = vmatprep.subr.bf16.mxu1 %v4086_v4  ;;  %v4355_v9 = vpop.permute.xlu0 %1439  ;;  %v936_v10 = vpop.permute.xlu1 %935  ;;  %979 = vmatprep.mubr.bf16.mxu0 %v4082_v0 }
  0xc1   : > { %1063 = vmatprep.subr.bf16.mxu0 %v1055_v8  ;;  %v940_v11 = vsel %vm937_vm6, %v4282_v40, %v936_v10  ;;  %v1447_v45 = vsel %vm346_vm1, %v4355_v9, %v4343_v6  ;;  %v4057_v6 = vld [vmem:[%s4778_s4 + $0x20] sm:$0xff]   ;;  %v4058_v10 = vld [vmem:[%s4778_s4 + $0x28] sm:$0xff]  }
  0xc4   : > { %v1052_v12 = vpop.permute.xlu0 %1051  ;;  %v4360_v13 = vpop.permute.xlu1 %1547 }
  0xc5   : > { %3795 = vmatmul.mubr.msk.bf16.vlgmr.msra.gmra.mrb[16].mxu1 %vm353_vm3, %v4046_v2  ;;  %v1056_v21 = vsel %vm1053_vm7, %v4292_v47, %v1052_v12 }
  0xc6   : > { %3799 = vmatpush3.bf16.msra.mxu1 %v940_v11  ;;  %3800 = vmatprep.mubr.msk.bf16.mxu1 %vm4088_vm0, %v4086_v4 }
  0xc7   : > { %3804 = vmatprep.subr.bf16.mxu1 %v4086_v4 }
  0xc8   : > { %v4371_v18 = vpop.permute.xlu0 %1549  ;;  %v4378_v20 = vpop.permute.xlu1 %1545 }
  0xc9   : > { %v1554_v47 = vsel %vm454_vm2, %v4360_v13, %v4371_v18  ;;  %v1553_v51 = vsel %vm454_vm2, %v4378_v20, %v4360_v13 }
  0xca   : > { %3612 = vmatmul.mubr.msk.bf16.vlgmr.msra.gmra.mrb[0].mxu0 %vm353_vm3, %v4048_v15 }
  0xcb   : > { %1064 = vmatpush1.bf16.msra.mxu0 %v1054_v17  ;;  %1095 = vmatprep.mubr.bf16.mxu0 %v4082_v0 }
  0xcc   : > { %1179 = vmatprep.subr.bf16.mxu0 %v1171_v19  ;;  %v1168_v22 = vpop.permute.xlu0 %1167  ;;  %v4386_v23 = vpop.permute.xlu1 %1656  ;;  %v4060_v19 = vld [vmem:[%s4778_s4 + $0x38] sm:$0xff]  }
  0xcd   : > { %3801 = vmatmul.mubr.msk.bf16.vlgmr.msra.gmra.mrb[20].mxu1 %vm353_vm3, %v4048_v15  ;;  %v1172_v27 = vsel %vm1169_vm8, %v4311_v55, %v1168_v22  ;;  %v4061_v22 = vld [vmem:[%s4778_s4 + $0x40] sm:$0xff]  }
  0xce   : > { %3805 = vmatpush3.bf16.msra.mxu1 %v1056_v21  ;;  %3806 = vmatprep.mubr.msk.bf16.mxu1 %vm4088_vm0, %v4086_v4 }
  0xcf   : > { %3810 = vmatprep.subr.bf16.mxu1 %v4086_v4 }
  0xd0   : > { %v1659_v25 = vpop.permute.xlu0 %1658  ;;  %v4401_v29 = vpop.permute.xlu1 %1654 }
  0xd1   : > { %v1663_v53 = vsel %vm564_vm4, %v4386_v23, %v1659_v25  ;;  %v1662_v60 = vsel %vm564_vm4, %v4401_v29, %v4386_v23 }
  0xd4   : > { %v1284_v32 = vpop.permute.xlu0 %1283  ;;  %v1446_v35 = vpop.permute.xlu1 %1445 }
  0xd5   : > { %3807 = vmatmul.mubr.msk.bf16.vlgmr.msra.gmra.mrb[24].mxu1 %vm353_vm3, %v4049_v24  ;;  %v1288_v34 = vsel %vm1285_vm9, %v4333_v63, %v1284_v32  ;;  %v1449_v40 = vsel %vm346_vm1, %v4345_v7, %v1446_v35  ;;  %v4056_v63 = vld [vmem:[%s4155_s10 + $0x34] ss:$20 sps:$4 sm:$0xff]  }
  0xd6   : > { %3617 = vmatmul.mubr.msk.bf16.vlgmr.msra.gmra.mrb[0].mxu0 %vm353_vm3, %v4049_v24  ;;  %3811 = vmatpush3.bf16.msra.mxu1 %v1172_v27 }
  0xd7   : > { %1180 = vmatpush1.bf16.msra.mxu0 %v1170_v26  ;;  %3812 = vmatprep.mubr.msk.bf16.mxu1 %vm4088_vm0, %v4086_v4 }
  0xd8   : > { %1211 = vmatprep.mubr.bf16.mxu0 %v4082_v0  ;;  %3816 = vmatprep.subr.bf16.mxu1 %v4086_v4  ;;  %v1774_v39 = vpop.permute.xlu1 %1773  ;;  %v1772_v41 = vpop.permute.xlu0 %1771 }
  0xd9   : > { %1295 = vmatprep.subr.bf16.mxu0 %v1287_v28  ;;  %v1778_v61 = vsel %vm680_vm5, %v1772_v41, %v1774_v39 }
  0xdc   : > { %v1552_v42 = vpop.permute.xlu1 %1551  ;;  %v1770_v44 = vpop.permute.xlu0 %1769 }
  0xdd   : > { %3813 = vmatmul.mubr.msk.bf16.vlgmr.msra.gmra.mrb[28].mxu1 %vm353_vm3, %v4050_v33  ;;  %v1555_v46 = vsel %vm454_vm2, %v4371_v18, %v1552_v42  ;;  %v1777_v7 = vsel %vm680_vm5, %v1770_v44, %v1772_v41 }
  0xde   : > { %3817 = vmatpush3.bf16.msra.mxu1 %v1288_v34  ;;  %3818 = vmatprep.mubr.msk.bf16.mxu1 %vm4088_vm0, %v4086_v4 }
  0xdf   : > { %3822 = vmatprep.subr.bf16.mxu1 %v4086_v4 }
  0xe0   : > { %v1661_v48 = vpop.permute.xlu0 %1660  ;;  %v1776_v50 = vpop.permute.xlu1 %1775 }
  0xe1   : > { %v1664_v52 = vsel %vm564_vm4, %v1659_v25, %v1661_v48  ;;  %v1779_v57 = vsel %vm680_vm5, %v1774_v39, %v1776_v50 }
  0xe2   : > { %3622 = vmatmul.mubr.msk.bf16.vlgmr.msra.gmra.mrb[0].mxu0 %vm353_vm3, %v4050_v33 }
  0xe3   : > { %1296 = vmatpush1.bf16.msra.mxu0 %v1286_v36  ;;  %1327 = vmatprep.mubr.bf16.mxu0 %v4082_v0 }
  0xe4   : > { %1456 = vmatprep.subr.bf16.mxu0 %v1448_v37  ;;  %v4467_v54 = vpop.permute.xlu0 %2027  ;;  %v2030_v55 = vpop.permute.xlu1 %2029 }
  0xe5   : > { %3819 = vmatmul.mubr.msk.bf16.vlgmr.msra.gmra.mrb[32].mxu1 %vm353_vm3, %v4051_v38  ;;  %v2034_v13 = vsel %vm937_vm6, %v4467_v54, %v2030_v55 }
  0xe6   : > { %3823 = vmatpush3.bf16.msra.mxu1 %v1449_v40  ;;  %3824 = vmatprep.mubr.msk.bf16.mxu1 %vm4088_vm0, %v4086_v4 }
  0xe7   : > { %3828 = vmatprep.subr.bf16.mxu1 %v4086_v4 }
  0xe8   : > { %v2026_v58 = vpop.permute.xlu0 %2025  ;;  %v4477_v59 = vpop.permute.xlu1 %2142 }
  0xec   : > { %v2145_v1 = vpop.permute.xlu0 %2144  ;;  %v2141_v2 = vpop.permute.xlu1 %2140 }
  0xed   : > { %3825 = vmatmul.mubr.msk.bf16.vlgmr.msra.gmra.mrb[36].mxu1 %vm353_vm3, %v4052_v43  ;;  %v2149_v21 = vsel %vm1053_vm7, %v4477_v59, %v2145_v1  ;;  %v2148_v23 = vsel %vm1053_vm7, %v2141_v2, %v4477_v59 }
  0xee   : > { %3627 = vmatmul.mubr.msk.bf16.vlgmr.msra.gmra.mrb[0].mxu0 %vm353_vm3, %v4051_v38  ;;  %3829 = vmatpush3.bf16.msra.mxu1 %v1555_v46 }
  0xef   : > { %1457 = vmatpush1.bf16.msra.mxu0 %v1447_v45  ;;  %3830 = vmatprep.mubr.msk.bf16.mxu1 %vm4088_vm0, %v4086_v4 }
  0xf0   : > { %1488 = vmatprep.mubr.bf16.mxu0 %v4082_v0  ;;  %1562 = vmatprep.subr.bf16.mxu0 %v1554_v47  ;;  %v2032_v3 = vpop.permute.xlu0 %2031  ;;  %v2147_v5 = vpop.permute.xlu1 %2146 }
  0xf1   : > { %3834 = vmatprep.subr.bf16.mxu1 %v4086_v4  ;;  %v2035_v8 = vsel %vm937_vm6, %v2030_v55, %v2032_v3  ;;  %v2150_v11 = vsel %vm1053_vm7, %v2145_v1, %v2147_v5 }
  0xf4   : > { %v2260_v9 = vpop.permute.xlu1 %2259  ;;  %v2258_v24 = vpop.permute.xlu0 %2257 }
  0xf5   : > { %3831 = vmatmul.mubr.msk.bf16.vlgmr.msra.gmra.mrb[40].mxu1 %vm353_vm3, %v4053_v49  ;;  %v2264_v25 = vsel %vm1169_vm8, %v2258_v24, %v2260_v9 }
  0xf6   : > { %3636 = vmatmul.mubr.msk.bf16.vlgmr.msra.gmra.mrb[4].mxu0 %vm353_vm3, %v4052_v43  ;;  %3835 = vmatpush3.bf16.msra.mxu1 %v1664_v52 }
  0xf7   : > { %1563 = vmatpush1.bf16.msra.mxu0 %v1553_v51  ;;  %3836 = vmatprep.mubr.msk.bf16.mxu1 %vm4088_vm0, %v4086_v4 }
  0xf8   : > { %1594 = vmatprep.mubr.bf16.mxu0 %v4082_v0  ;;  %3840 = vmatprep.subr.bf16.mxu1 %v4086_v4  ;;  %v2262_v12 = vpop.permute.xlu1 %2261  ;;  %v2256_v26 = vpop.permute.xlu0 %2255 }
  0xf9   : > { %1671 = vmatprep.subr.bf16.mxu0 %v1663_v53  ;;  %v2265_v17 = vsel %vm1169_vm8, %v2260_v9, %v2262_v12  ;;  %v2263_v27 = vsel %vm1169_vm8, %v2256_v26, %v2258_v24 }
  0xfc   : > { %v2373_v28 = vpop.permute.xlu0 %2372 }
  0xfd   : > { %3837 = vmatmul.mubr.msk.bf16.vlgmr.msra.gmra.mrb[44].mxu1 %vm353_vm3, %v4054_v56  ;;  %v2375_v15 = vpop.permute.xlu1 %2374 }
  0xfe   : > { %3841 = vmatpush3.bf16.msra.mxu1 %v1779_v57  ;;  %3842 = vmatprep.mubr.msk.bf16.mxu1 %vm4088_vm0, %v4086_v4  ;;  %v2379_v29 = vsel %vm1285_vm9, %v2373_v28, %v2375_v15 }
  0xff   : > { %3846 = vmatprep.subr.bf16.mxu1 %v4086_v4 }
 0x102   : > { %3639 = vmatmul.mubr.msk.bf16.vlgmr.msra.gmra.mrb[4].mxu0 %vm353_vm3, %v4053_v49  ;;  %v2377_v18 = vpop.permute.xlu1 %2376  ;;  %v2371_v30 = vpop.permute.xlu0 %2370 }
 0x103   : > { %1672 = vmatpush1.bf16.msra.mxu0 %v1662_v60  ;;  %1703 = vmatprep.mubr.bf16.mxu0 %v4082_v0  ;;  %v2380_v20 = vsel %vm1285_vm9, %v2375_v15, %v2377_v18  ;;  %v2378_v31 = vsel %vm1285_vm9, %v2371_v30, %v2373_v28 }
 0x104   : > { %1786 = vmatprep.subr.bf16.mxu0 %v1778_v61 }
 0x105   : > { %3843 = vmatmul.mubr.msk.bf16.vlgmr.msra.gmra.mrb[48].mxu1 %vm353_vm3, %v4055_v62 }
 0x106   : > { %3847 = vmatpush3.bf16.msra.mxu1 %v4056_v63  ;;  %3848 = vmatprep.mubr.msk.bf16.mxu1 %vm4088_vm0, %v4086_v4 }
 0x107   : > { %3852 = vmatprep.subr.bf16.mxu1 %v4086_v4 }
 0x10d   : > { %3849 = vmatmul.mubr.msk.bf16.vlgmr.msra.gmra.mrb[52].mxu1 %vm353_vm3, %v4057_v6 }
 0x10e   : > { %3644 = vmatmul.mubr.msk.bf16.vlgmr.msra.gmra.mrb[4].mxu0 %vm353_vm3, %v4054_v56  ;;  %3853 = vmatpush3.bf16.msra.mxu1 %v2035_v8 }
 0x10f   : > { %1787 = vmatpush1.bf16.msra.mxu0 %v1777_v7  ;;  %3854 = vmatprep.mubr.msk.bf16.mxu1 %vm4088_vm0, %v4086_v4 }
 0x110   : > { %1818 = vmatprep.mubr.bf16.mxu0 %v4082_v0  ;;  %3858 = vmatprep.subr.bf16.mxu1 %v4086_v4 }
 0x111   : > { %1907 = vmatprep.subr.bf16.mxu0 %v4233_v14  ;;  %v4059_v14 = vld [vmem:[%s4778_s4 + $0x30] sm:$0xff]  }
 0x115   : > { %3855 = vmatmul.mubr.msk.bf16.vlgmr.msra.gmra.mrb[56].mxu1 %vm353_vm3, %v4058_v10 }
 0x116   : > { %3859 = vmatpush3.bf16.msra.mxu1 %v2150_v11  ;;  %3860 = vmatprep.mubr.msk.bf16.mxu1 %vm4088_vm0, %v4086_v4 }
 0x117   : > { %3864 = vmatprep.subr.bf16.mxu1 %v4086_v4 }
 0x11a   : > { %3649 = vmatmul.mubr.msk.bf16.vlgmr.msra.gmra.mrb[4].mxu0 %vm353_vm3, %v4055_v62 }
 0x11b   : > { %1908 = vmatpush1.bf16.msra.mxu0 %v4240_v16  ;;  %1939 = vmatprep.mubr.bf16.mxu0 %v4082_v0  ;;  %v2033_v16 = vsel %vm937_vm6, %v2026_v58, %v4467_v54 }
 0x11c   : > { %2042 = vmatprep.subr.bf16.mxu0 %v2034_v13 }
 0x11d   : > { %3861 = vmatmul.mubr.msk.bf16.vlgmr.msra.gmra.mrb[60].mxu1 %vm353_vm3, %v4059_v14 }
 0x11e   : > { %3865 = vmatpush3.bf16.msra.mxu1 %v2265_v17  ;;  %3866 = vmatprep.mubr.msk.bf16.mxu1 %vm4088_vm0, %v4086_v4 }
 0x11f   : > { %3870 = vmatprep.subr.bf16.mxu1 %v4086_v4 }
 0x125   : > { %3867 = vmatmul.mubr.msk.bf16.vlgmr.msra.gmra.mrb[64].mxu1 %vm353_vm3, %v4060_v19 }
 0x126   : > { %3657 = vmatmul.mubr.msk.bf16.vlgmr.msra.gmra.mrb[4].mxu0 %vm353_vm3, %v4057_v6  ;;  %3871 = vmatpush3.bf16.msra.mxu1 %v2380_v20 }
 0x127   : > { %2043 = vmatpush1.bf16.msra.mxu0 %v2033_v16  ;;  %3872 = vmatprep.mubr.msk.bf16.mxu1 %vm4088_vm0, %v4086_v4 }
 0x128   : > { %2074 = vmatprep.mubr.bf16.mxu0 %v4082_v0  ;;  %2157 = vmatprep.subr.bf16.mxu0 %v2149_v21 }
 0x129   : > { %3876 = vmatprep.subr.bf16.mxu1 %v4086_v4 }
 0x12d   : > { %3873 = vmatmul.mubr.msk.bf16.vlgmr.msra.gmra.mrb[68].mxu1 %vm353_vm3, %v4061_v22 }
 0x12e   : > { %3878 = vmatprep.mubr.msk.bf16.mxu1 %vm4088_vm0, %v4086_v4 }
 0x132   : > { %3666 = vmatmul.mubr.msk.bf16.vlgmr.msra.gmra.mrb[4].mxu0 %vm353_vm3, %v4058_v10 }
 0x133   : > { %2158 = vmatpush1.bf16.msra.mxu0 %v2148_v23  ;;  %2189 = vmatprep.mubr.bf16.mxu0 %v4082_v0 }
 0x134   : > { %2272 = vmatprep.subr.bf16.mxu0 %v2264_v25 }
 0x13e   : > { %3671 = vmatmul.mubr.msk.bf16.vlgmr.msra.gmra.mrb[4].mxu0 %vm353_vm3, %v4059_v14 }
 0x13f   : > { %2273 = vmatpush1.bf16.msra.mxu0 %v2263_v27  ;;  %2304 = vmatprep.mubr.bf16.mxu0 %v4082_v0 }
 0x140   : > { %2387 = vmatprep.subr.bf16.mxu0 %v2379_v29 }
 0x14a   : > { %3676 = vmatmul.mubr.msk.bf16.vlgmr.msra.gmra.mrb[4].mxu0 %vm353_vm3, %v4060_v19 }
 0x14b   : > { %2388 = vmatpush1.bf16.msra.mxu0 %v2378_v31  ;;  %2419 = vmatprep.mubr.bf16.mxu0 %v4082_v0 }
 0x156   : > { %3681 = vmatmul.mubr.msk.bf16.vlgmr.msra.gmra.mrb[4].mxu0 %vm353_vm3, %v4061_v22 }
 0x157   : > { %2595 = vmatprep.mubr.bf16.mxu0 %v4082_v0 }
 0x178   : > { %v434_v32 = vpop.f32.mrb[0].mxu1 }
 0x179   : > { %v3772_v33 = vpop.f32.mrb[1].mxu1 }
 0x17a   : > { %v437_v34 = vpop.f32.mrb[2].mxu1 }
 0x17b   : > { %v3773_v35 = vpop.f32.mrb[3].mxu1 }
 0x180   : > { %v541_v36 = vpop.f32.mrb[4].mxu1 }
 0x181   : > { %v542_v37 = vadd.f32 %v541_v36, %v434_v32  ;;  %v3778_v38 = vpop.f32.mrb[5].mxu1 }
 0x182   : > { %v544_v39 = vpop.f32.mrb[6].mxu1 }
 0x183   : > { %v545_v40 = vadd.f32 %v544_v39, %v437_v34  ;;  %v3779_v41 = vpop.f32.mrb[7].mxu1 }
 0x188   : > { %v651_v42 = vpop.f32.mrb[8].mxu1 }
 0x189   : > { %v660_v43 = vadd.f32 %v651_v42, %v542_v37  ;;  %v3784_v44 = vpop.f32.mrb[9].mxu1 }
 0x18a   : > { %v654_v45 = vpop.f32.mrb[10].mxu1 }
 0x18b   : > { %v663_v46 = vadd.f32 %v654_v45, %v545_v40  ;;  %v3785_v47 = vpop.f32.mrb[11].mxu1 }
 0x190   : > { %v767_v48 = vpop.f32.mrb[12].mxu1 }
 0x191   : > { %v776_v49 = vadd.f32 %v767_v48, %v660_v43  ;;  %v3790_v50 = vpop.f32.mrb[13].mxu1 }
 0x192   : > { %v770_v51 = vpop.f32.mrb[14].mxu1 }
 0x193   : > { %v779_v52 = vadd.f32 %v770_v51, %v663_v46  ;;  %v3791_v53 = vpop.f32.mrb[15].mxu1 }
 0x198   : > { %v888_v54 = vpop.f32.mrb[16].mxu1 }
 0x199   : > { %v897_v55 = vadd.f32 %v888_v54, %v776_v49  ;;  %v3796_v56 = vpop.f32.mrb[17].mxu1 }
 0x19a   : > { %v891_v57 = vpop.f32.mrb[18].mxu1 }
 0x19b   : > { %v900_v58 = vadd.f32 %v891_v57, %v779_v52  ;;  %v3797_v59 = vpop.f32.mrb[19].mxu1 }
 0x1a0   : > { %v1024_v60 = vpop.f32.mrb[20].mxu1 }
 0x1a1   : > { %v1033_v61 = vadd.f32 %v1024_v60, %v897_v55  ;;  %v3802_v62 = vpop.f32.mrb[21].mxu1 }
 0x1a2   : > { %v1027_v63 = vpop.f32.mrb[22].mxu1 }
 0x1a3   : > { %v1036_v1 = vadd.f32 %v1027_v63, %v900_v58  ;;  %v3803_v2 = vpop.f32.mrb[23].mxu1 }
 0x1a8   : > { %v1140_v3 = vpop.f32.mrb[24].mxu1 }
 0x1a9   : > { %v1149_v5 = vadd.f32 %v1140_v3, %v1033_v61  ;;  %v3808_v6 = vpop.f32.mrb[25].mxu1 }
 0x1aa   : > { %v1143_v7 = vpop.f32.mrb[26].mxu1 }
 0x1ab   : > { %v1152_v8 = vadd.f32 %v1143_v7, %v1036_v1  ;;  %v3809_v9 = vpop.f32.mrb[27].mxu1 }
 0x1b0   : > { %v1256_v10 = vpop.f32.mrb[28].mxu1 }
 0x1b1   : > { %v1265_v11 = vadd.f32 %v1256_v10, %v1149_v5  ;;  %v3814_v12 = vpop.f32.mrb[29].mxu1  ;;  %v2508_v10 = vlaneseq }
 0x1b2   : > { %v1259_v13 = vpop.f32.mrb[30].mxu1  ;;  %v1390_v12 = vpop.permute.xlu0 %1389 }
 0x1b3   : > { %v1268_v14 = vadd.f32 %v1259_v13, %v1152_v8  ;;  %v3815_v15 = vpop.f32.mrb[31].mxu1  ;;  %v4575_v13 = vshrl.u32 %v2508_v10, 7  ;;  %vm3513_vm10 = vcmp.lt.s32.totalorder %v2508_v10, 384 }
 0x1b8   : > { %v1372_v17 = vpop.f32.mrb[32].mxu1 }
 0x1b9   : > { %v1381_v18 = vadd.f32 %v1372_v17, %v1265_v11  ;;  %v3820_v19 = vpop.f32.mrb[33].mxu1  ;;  %v1395_v11 = vpop.permute.xlu1 %1394 }
 0x1ba   : > { %v1375_v16 = vpop.f32.mrb[34].mxu1 }
 0x1bb   : > { %v4564_v20 = vadd.f32 %v1375_v16, %v1268_v14  ;;  %v3821_v21 = vpop.f32.mrb[35].mxu1  ;;  %v1399_v17 = vadd.f32 %v1390_v12, %v1381_v18 }
 0x1bd   : > { %v2482_v15 = vpop.permute.xlu1 %2481 }
 0x1c0   : > { %v1533_v23 = vpop.f32.mrb[36].mxu1 }
 0x1c1   : > { %v4566_v22 = vpop.f32.mrb[0].mxu0  ;;  %v3826_v25 = vpop.f32.mrb[37].mxu1 }
 0x1c2   : > { %v4568_v24 = vpop.f32.mrb[1].mxu0  ;;  %v1536_v27 = vpop.f32.mrb[38].mxu1  ;;  %v1402_v25 = vadd.f32 %v1395_v11, %v4564_v20 }
 0x1c3   : > { %v4570_v26 = vpop.f32.mrb[2].mxu0  ;;  %v3827_v29 = vpop.f32.mrb[39].mxu1 }
 0x1c4   : > { %v4572_v28 = vpop.f32.mrb[3].mxu0  ;;  %v2518_v29 = vsub.s32 2, %v4575_v13 }
 0x1c8   : > { %v1639_v30 = vpop.f32.mrb[40].mxu1 }
 0x1c9   : > { %v1640_v31 = vadd.f32 %v1639_v30, %v1533_v23  ;;  %v3832_v32 = vpop.f32.mrb[41].mxu1  ;;  %v2487_v23 = vpop.permute.xlu0 %2486 }
 0x1ca   : > { %v1642_v33 = vpop.f32.mrb[42].mxu1  ;;  %v305_v32 = vld [vmem:[%s4774_s0] sm:$0x7] }
 0x1cb   : > { %v1643_v34 = vadd.f32 %v1642_v33, %v1536_v27  ;;  %v3833_v35 = vpop.f32.mrb[43].mxu1  ;;  %v1405_v33 = vmax.f32 %v1399_v17, 0.0  ;;  %v2519_v18 = vrot.slane %v305_v32, %v2518_v29 }
 0x1d0   : > { %v1748_v36 = vpop.f32.mrb[44].mxu1 }
 0x1d1   : > { %v1757_v37 = vadd.f32 %v1748_v36, %v1640_v31  ;;  %v3838_v38 = vpop.f32.mrb[45].mxu1  ;;  %v1408_v36 = vmax.f32 %v1402_v25, 0.0 }
 0x1d2   : > { %v1751_v39 = vpop.f32.mrb[46].mxu1 }
 0x1d3   : > { %v1760_v40 = vadd.f32 %v1751_v39, %v1643_v34  ;;  %v3839_v41 = vpop.f32.mrb[47].mxu1 }
 0x1d8   : > { %v1863_v42 = vpop.f32.mrb[48].mxu1 }
 0x1d9   : > { %v1872_v43 = vadd.f32 %v1863_v42, %v1757_v37  ;;  %v3844_v44 = vpop.f32.mrb[49].mxu1  ;;  %v1397_v42 = vadd.f32 %v1390_v12, %v4566_v22 }
 0x1da   : > { %v1866_v45 = vpop.f32.mrb[50].mxu1 }
 0x1db   : > { %v1875_v46 = vadd.f32 %v1866_v45, %v1760_v40  ;;  %v3845_v47 = vpop.f32.mrb[51].mxu1  ;;  %v1400_v45 = vadd.f32 %v1395_v11, %v4570_v26 }
 0x1dc   : > { %v2510_v47 = vsub.s32 0, %v4575_v13 }
 0x1de   : > { %v2511_v26 = vrot.slane %v305_v32, %v2510_v47 }
 0x1e0   : > { %v1984_v48 = vpop.f32.mrb[52].mxu1 }
 0x1e1   : > { %v1993_v49 = vadd.f32 %v1984_v48, %v1872_v43  ;;  %v3850_v50 = vpop.f32.mrb[53].mxu1  ;;  %v1398_v43 = vadd.f32 %v1390_v12, %v4568_v24 }
 0x1e2   : > { %v1987_v51 = vpop.f32.mrb[54].mxu1 }
 0x1e3   : > { %v1996_v52 = vadd.f32 %v1987_v51, %v1875_v46  ;;  %v3851_v53 = vpop.f32.mrb[55].mxu1  ;;  %v2514_v51 = vsub.s32 1, %v4575_v13  ;;  %v1404_v22 = vmax.f32 %v1398_v43, 0.0 }
 0x1e4   : > { %v1403_v53 = vmax.f32 %v1397_v42, 0.0 }
 0x1e8   : > { %v2119_v54 = vpop.f32.mrb[56].mxu1 }
 0x1e9   : > { %v2128_v55 = vadd.f32 %v2119_v54, %v1993_v49  ;;  %v3856_v56 = vpop.f32.mrb[57].mxu1  ;;  %v1401_v49 = vadd.f32 %v1395_v11, %v4572_v28  ;;  %v3457_v11 = vld [vmem:[%s4781_s7] sm:$0xff] }
 0x1ea   : > { %v2122_v57 = vpop.f32.mrb[58].mxu1 }
 0x1eb   : > { %v2131_v58 = vadd.f32 %v2122_v57, %v1996_v52  ;;  %v3857_v59 = vpop.f32.mrb[59].mxu1 }
 0x1f0   : > { %v2234_v60 = vpop.f32.mrb[60].mxu1 }
 0x1f1   : > { %v2243_v61 = vadd.f32 %v2234_v60, %v2128_v55  ;;  %v3862_v62 = vpop.f32.mrb[61].mxu1 }
 0x1f2   : > { %v2237_v63 = vpop.f32.mrb[62].mxu1 }
 0x1f3   : > { %v2246_v1 = vadd.f32 %v2237_v63, %v2131_v58  ;;  %v3863_v2 = vpop.f32.mrb[63].mxu1  ;;  %v1406_v58 = vmax.f32 %v1400_v45, 0.0  ;;  %v2515_v63 = vrot.slane %v305_v32, %v2514_v51 }
 0x1f8   : > { %v2349_v3 = vpop.f32.mrb[64].mxu1 }
 0x1f9   : > { %v2358_v5 = vadd.f32 %v2349_v3, %v2243_v61  ;;  %v3868_v6 = vpop.f32.mrb[65].mxu1  ;;  %v1407_v61 = vmax.f32 %v1401_v49, 0.0  ;;  %v3691_v49 = vld [vmem:[%s4780_s6 + $0xc] sm:$0xf] }
 0x1fa   : > { %v2352_v7 = vpop.f32.mrb[66].mxu1 }
 0x1fb   : > { %v2361_v8 = vadd.f32 %v2352_v7, %v2246_v1  ;;  %v3869_v9 = vpop.f32.mrb[67].mxu1 }
 0x200   : > { %v2464_v14 = vpop.f32.mrb[68].mxu1 }
 0x201   : > { %v2473_v19 = vadd.f32 %v2464_v14, %v2358_v5  ;;  %v3874_v16 = vpop.f32.mrb[69].mxu1 }
 0x202   : > { %v2467_v21 = vpop.f32.mrb[70].mxu1 }
 0x203   : > { %v2476_v27 = vadd.f32 %v2467_v21, %v2361_v8  ;;  %v2491_v30 = vadd.f32 %v2482_v15, %v2473_v19  ;;  %v3875_v31 = vpop.f32.mrb[71].mxu1 }
 0x205   : > { %v2497_v34 = vmax.f32 %v2491_v30, 0.0  ;;  %v2494_v35 = vadd.f32 %v2487_v23, %v2476_v27 }
 0x207   : > { %v2503_v37 = vadd.f32 %v2497_v34, %v1405_v33  ;;  %v2500_v38 = vmax.f32 %v2494_v35, 0.0  ;;  %v2535_v34 = vld [vmem:[%s4780_s6] sm:$0xf] }
 0x209   : > { %v2506_v39 = vadd.f32 %v2500_v38, %v1408_v36  ;;  %v2525_v40 = vmul.f32 %v2519_v18, %v2503_v37 }
 0x20b   : > { %v2528_v41 = vmul.f32 %v2519_v18, %v2506_v39 }
 0x20d   : > { %v4582_v20 = vpack.c.bf16 %v2528_v41, %v2525_v40  ;;  %v3688_v41 = vld [vmem:[%s4780_s6 + $0x8] sm:$0xf] }
 0x229   : > { %v2421_v44 = vpop.f32.mrb[4].mxu0 }
 0x22a   : > { %v2489_v46 = vadd.f32 %v2482_v15, %v2421_v44  ;;  %v2423_v48 = vpop.f32.mrb[5].mxu0 }
 0x22b   : > { %v2490_v50 = vadd.f32 %v2482_v15, %v2423_v48  ;;  %v2425_v52 = vpop.f32.mrb[6].mxu0 }
 0x22c   : > { %v2495_v54 = vmax.f32 %v2489_v46, 0.0  ;;  %v2492_v55 = vadd.f32 %v2487_v23, %v2425_v52  ;;  %v2427_v56 = vpop.f32.mrb[7].mxu0 }
 0x22d   : > { %v2496_v57 = vmax.f32 %v2490_v50, 0.0  ;;  %v2493_v24 = vadd.f32 %v2487_v23, %v2427_v56  ;;  %v3683_v23 = vld [vmem:[%s4780_s6 + $0x4] sm:$0xf] }
 0x22e   : > { %v2501_v59 = vadd.f32 %v2495_v54, %v1403_v53  ;;  %v2498_v60 = vmax.f32 %v2492_v55, 0.0  ;;  %v3694_v55 = vld [vmem:[%s4780_s6 + $0x10] sm:$0xf] }
 0x22f   : > { %v2502_v62 = vadd.f32 %v2496_v57, %v1404_v22  ;;  %v2499_v1 = vmax.f32 %v2493_v24, 0.0 }
 0x230   : > { %v2504_v28 = vadd.f32 %v2498_v60, %v1406_v58  ;;  %v2523_v3 = vmul.f32 %v2511_v26, %v2501_v59 }
 0x231   : > { %v2505_v2 = vadd.f32 %v2499_v1, %v1407_v61  ;;  %v2524_v6 = vmul.f32 %v2515_v63, %v2502_v62 }
 0x232   : > { %v2526_v5 = vmul.f32 %v2511_v26, %v2504_v28  ;;  %v3697_v26 = vld [vmem:[%s4780_s6 + $0x14] sm:$0xf] }
 0x233   : > { %v2527_v7 = vmul.f32 %v2515_v63, %v2505_v2 }
 0x234   : > { %v4590_v8 = vpack.c.bf16 %v2526_v5, %v2523_v3  ;;  %v3700_v3 = vld [vmem:[%s4780_s6 + $0x18] sm:$0xf] }
 0x235   : > { %v4592_v9 = vpack.c.bf16 %v2527_v7, %v2524_v6 }
 0x236   : > { %2548 = vrot.lane.b32.xlu1 %v4590_v8, %s4083_s11 }
 0x237   : > { %2550 = vrot.lane.b32.xlu0 %v4592_v9, %s4083_s11 }
 0x23a   : > { %2546 = vrot.lane.b32.xlu1 %v4082_v0, %s4083_s11 }
 0x23b   : > { %2552 = vrot.lane.b32.xlu0 %v4582_v20, %s4083_s11  ;;  %s3995_s11 = smul.u32 3, %s4784_s28 }
 0x23e   : > { %2646 = vrot.lane.b32.xlu1 %v4590_v8, %s4084_s12 }
 0x23f   : > { %2648 = vrot.lane.b32.xlu0 %v4592_v9, %s4084_s12 }
 0x242   : > { %2644 = vrot.lane.b32.xlu1 %v4082_v0, %s4084_s12 }
 0x243   : > { %2650 = vrot.lane.b32.xlu0 %v4582_v20, %s4084_s12 }
 0x246   : > { %2746 = vrot.lane.b32.xlu1 %v4590_v8, %s4085_s13 }
 0x247   : > { %2748 = vrot.lane.b32.xlu0 %v4592_v9, %s4085_s13 }
 0x24a   : > { %2744 = vrot.lane.b32.xlu1 %v4082_v0, %s4085_s13 }
 0x24b   : > { %2750 = vrot.lane.b32.xlu0 %v4582_v20, %s4085_s13 }
 0x24e   : > { %2849 = vrot.lane.b32.xlu1 %v4590_v8, %s4087_s14 }
 0x24f   : > { %2851 = vrot.lane.b32.xlu0 %v4592_v9, %s4087_s14 }
 0x252   : > { %2847 = vrot.lane.b32.xlu1 %v4082_v0, %s4087_s14 }
 0x253   : > { %2853 = vrot.lane.b32.xlu0 %v4582_v20, %s4087_s14  ;;  %s303_s14 = scalar_lea.vmem %s4782_s8, %s3995_s11 }
 0x256   : > { %3049 = vrot.lane.b32.xlu1 %v4592_v9, %s4089_s15 }
 0x257   : > { %3051 = vrot.lane.b32.xlu0 %v4582_v20, %s4089_s15 }
 0x25a   : > { %3047 = vrot.lane.b32.xlu1 %v4590_v8, %s4089_s15 }
 0x25b   : > { %3053 = vrot.lane.b32.xlu0 %v4082_v0, %s4089_s15 }
 0x25e   : > { %3152 = vrot.lane.b32.xlu1 %v4592_v9, %s4090_s16 }
 0x25f   : > { %3154 = vrot.lane.b32.xlu0 %v4582_v20, %s4090_s16 }
 0x262   : > { %3150 = vrot.lane.b32.xlu1 %v4590_v8, %s4090_s16 }
 0x263   : > { %3156 = vrot.lane.b32.xlu0 %v4082_v0, %s4090_s16 }
 0x266   : > { %3255 = vrot.lane.b32.xlu1 %v4592_v9, %s4091_s17 }
 0x267   : > { %3257 = vrot.lane.b32.xlu0 %v4582_v20, %s4091_s17 }
 0x26a   : > { %3253 = vrot.lane.b32.xlu1 %v4590_v8, %s4091_s17 }
 0x26b   : > { %3259 = vrot.lane.b32.xlu0 %v4082_v0, %s4091_s17 }
 0x26e   : > { %3358 = vrot.lane.b32.xlu1 %v4592_v9, %s4092_s18 }
 0x26f   : > { %3360 = vrot.lane.b32.xlu0 %v4582_v20, %s4092_s18 }
 0x272   : > { %3356 = vrot.lane.b32.xlu1 %v4590_v8, %s4092_s18 }
 0x273   : > { %3362 = vrot.lane.b32.xlu0 %v4082_v0, %s4092_s18 }
 0x276   : > { %3460 = vperm.xlu1 %4017, %v3457_v11  }
 0x2a8   : > { %v2549_v12 = vpop.permute.xlu1 %2548 }
 0x2a9   : > { %v2551_v14 = vpop.permute.xlu0 %2550 }
 0x2aa   : > { %v2555_v15 = vsel %vm346_vm1, %v2549_v12, %v2551_v14 }
 0x2ab   : > { %2563 = vmatprep.subr.bf16.mxu0 %v2555_v15 }
 0x2ac   : > { %v2547_v17 = vpop.permute.xlu1 %2546 }
 0x2ad   : > { %v2554_v19 = vsel %vm346_vm1, %v2547_v17, %v2549_v12  ;;  %v2553_v16 = vpop.permute.xlu0 %2552  ;;  %v3703_v12 = vld [vmem:[%s4780_s6 + $0x1c] sm:$0xf] }
 0x2ae   : > { %v2556_v21 = vsel %vm346_vm1, %v2551_v14, %v2553_v16  ;;  %2564 = vmatpush1.bf16.msra.mxu0 %v2554_v19  ;;  %v3706_v19 = vld [vmem:[%s4780_s6 + $0x20] sm:$0xf] }
 0x2af   : > { %3877 = vmatpush3.bf16.msra.mxu1 %v2556_v21 }
 0x2b0   : > { %v2647_v25 = vpop.permute.xlu1 %2646  ;;  %3882 = vmatprep.subr.bf16.mxu1 %v4086_v4 }
 0x2b1   : > { %v2649_v27 = vpop.permute.xlu0 %2648  ;;  %3684 = vmatmul.mubr.msk.bf16.vlgmr.msra.gmra.mrb[8].mxu0 %vm353_vm3, %v3683_v23 }
 0x2b2   : > { %3879 = vmatmul.mubr.msk.bf16.vlgmr.msra.gmra.mrb[72].mxu1 %vm353_vm3, %v3683_v23  ;;  %v2653_v29 = vsel %vm454_vm2, %v2647_v25, %v2649_v27  ;;  %2693 = vmatprep.mubr.bf16.mxu0 %v4082_v0 }
 0x2b3   : > { %2661 = vmatprep.subr.bf16.mxu0 %v2653_v29  ;;  %3884 = vmatprep.mubr.msk.bf16.mxu1 %vm4088_vm0, %v4086_v4 }
 0x2b4   : > { %v2645_v30 = vpop.permute.xlu1 %2644 }
 0x2b5   : > { %v2652_v31 = vsel %vm454_vm2, %v2645_v30, %v2647_v25  ;;  %v2651_v32 = vpop.permute.xlu0 %2650 }
 0x2b6   : > { %v2654_v33 = vsel %vm454_vm2, %v2649_v27, %v2651_v32  ;;  %2662 = vmatpush1.bf16.msra.mxu0 %v2652_v31 }
 0x2b7   : > { %3883 = vmatpush3.bf16.msra.mxu1 %v2654_v33 }
 0x2b8   : > { %v2747_v35 = vpop.permute.xlu1 %2746  ;;  %3888 = vmatprep.subr.bf16.mxu1 %v4086_v4 }
 0x2b9   : > { %v2749_v36 = vpop.permute.xlu0 %2748  ;;  %3686 = vmatmul.mubr.msk.bf16.vlgmr.msra.gmra.mrb[12].mxu0 %vm353_vm3, %v2535_v34 }
 0x2ba   : > { %3885 = vmatmul.mubr.msk.bf16.vlgmr.msra.gmra.mrb[76].mxu1 %vm353_vm3, %v2535_v34  ;;  %v2753_v18 = vsel %vm564_vm4, %v2747_v35, %v2749_v36  ;;  %2793 = vmatprep.mubr.bf16.mxu0 %v4082_v0 }
 0x2bb   : > { %2761 = vmatprep.subr.bf16.mxu0 %v2753_v18  ;;  %3890 = vmatprep.mubr.msk.bf16.mxu1 %vm4088_vm0, %v4086_v4 }
 0x2bc   : > { %v2745_v37 = vpop.permute.xlu1 %2744 }
 0x2bd   : > { %v2752_v38 = vsel %vm564_vm4, %v2745_v37, %v2747_v35  ;;  %v2751_v39 = vpop.permute.xlu0 %2750 }
 0x2be   : > { %v2754_v40 = vsel %vm564_vm4, %v2749_v36, %v2751_v39  ;;  %2762 = vmatpush1.bf16.msra.mxu0 %v2752_v38 }
 0x2bf   : > { %3889 = vmatpush3.bf16.msra.mxu1 %v2754_v40 }
 0x2c0   : > { %v2850_v42 = vpop.permute.xlu1 %2849  ;;  %3894 = vmatprep.subr.bf16.mxu1 %v4086_v4 }
 0x2c1   : > { %v2852_v43 = vpop.permute.xlu0 %2851  ;;  %3689 = vmatmul.mubr.msk.bf16.vlgmr.msra.gmra.mrb[16].mxu0 %vm353_vm3, %v3688_v41 }
 0x2c2   : > { %3891 = vmatmul.mubr.msk.bf16.vlgmr.msra.gmra.mrb[80].mxu1 %vm353_vm3, %v3688_v41  ;;  %v2856_v44 = vsel %vm680_vm5, %v2850_v42, %v2852_v43  ;;  %2896 = vmatprep.mubr.bf16.mxu0 %v4082_v0 }
 0x2c3   : > { %2864 = vmatprep.subr.bf16.mxu0 %v2856_v44  ;;  %3896 = vmatprep.mubr.msk.bf16.mxu1 %vm4088_vm0, %v4086_v4 }
 0x2c4   : > { %v2848_v45 = vpop.permute.xlu1 %2847 }
 0x2c5   : > { %v2855_v46 = vsel %vm680_vm5, %v2848_v45, %v2850_v42  ;;  %v2854_v47 = vpop.permute.xlu0 %2853 }
 0x2c6   : > { %v2857_v48 = vsel %vm680_vm5, %v2852_v43, %v2854_v47  ;;  %2865 = vmatpush1.bf16.msra.mxu0 %v2855_v46 }
 0x2c7   : > { %3895 = vmatpush3.bf16.msra.mxu1 %v2857_v48  ;;  %2953 = vmatprep.subr.bf16.mxu0 %v4592_v9 }
 0x2c8   : > { %v3050_v50 = vpop.permute.xlu1 %3049  ;;  %3900 = vmatprep.subr.bf16.mxu1 %v4086_v4 }
 0x2c9   : > { %v3052_v51 = vpop.permute.xlu0 %3051  ;;  %3692 = vmatmul.mubr.msk.bf16.vlgmr.msra.gmra.mrb[20].mxu0 %vm353_vm3, %v3691_v49 }
 0x2ca   : > { %3897 = vmatmul.mubr.msk.bf16.vlgmr.msra.gmra.mrb[84].mxu1 %vm353_vm3, %v3691_v49  ;;  %2954 = vmatpush1.bf16.msra.mxu0 %v4590_v8  ;;  %v3056_v52 = vsel %vm937_vm6, %v3050_v50, %v3052_v51 }
 0x2cb   : > { %3901 = vmatpush3.bf16.msra.mxu1 %v4582_v20  ;;  %3064 = vmatprep.subr.bf16.mxu0 %v3056_v52 }
 0x2cc   : > { %v3048_v53 = vpop.permute.xlu1 %3047  ;;  %2985 = vmatprep.mubr.bf16.mxu0 %v4082_v0  ;;  %3902 = vmatprep.mubr.msk.bf16.mxu1 %vm4088_vm0, %v4086_v4 }
 0x2cd   : > { %v3054_v54 = vpop.permute.xlu0 %3053  ;;  %3906 = vmatprep.subr.bf16.mxu1 %v4086_v4  ;;  %v3055_v22 = vsel %vm937_vm6, %v3048_v53, %v3050_v50 }
 0x2ce   : > { %v3057_v20 = vsel %vm937_vm6, %v3052_v51, %v3054_v54 }
 0x2d0   : > { %v3153_v56 = vpop.permute.xlu1 %3152 }
 0x2d1   : > { %v3155_v57 = vpop.permute.xlu0 %3154  ;;  %3695 = vmatmul.mubr.msk.bf16.vlgmr.msra.gmra.mrb[24].mxu0 %vm353_vm3, %v3694_v55 }
 0x2d2   : > { %3065 = vmatpush1.bf16.msra.mxu0 %v3055_v22  ;;  %3903 = vmatmul.mubr.msk.bf16.vlgmr.msra.gmra.mrb[88].mxu1 %vm353_vm3, %v3694_v55  ;;  %v3159_v24 = vsel %vm1053_vm7, %v3153_v56, %v3155_v57 }
 0x2d3   : > { %3907 = vmatpush3.bf16.msra.mxu1 %v3057_v20  ;;  %3167 = vmatprep.subr.bf16.mxu0 %v3159_v24 }
 0x2d4   : > { %v3151_v58 = vpop.permute.xlu1 %3150  ;;  %3096 = vmatprep.mubr.bf16.mxu0 %v4082_v0  ;;  %3908 = vmatprep.mubr.msk.bf16.mxu1 %vm4088_vm0, %v4086_v4 }
 0x2d5   : > { %v3157_v59 = vpop.permute.xlu0 %3156  ;;  %3912 = vmatprep.subr.bf16.mxu1 %v4086_v4  ;;  %v3158_v61 = vsel %vm1053_vm7, %v3151_v58, %v3153_v56 }
 0x2d6   : > { %v3160_v63 = vsel %vm1053_vm7, %v3155_v57, %v3157_v59 }
 0x2d8   : > { %v3256_v60 = vpop.permute.xlu1 %3255 }
 0x2d9   : > { %v3258_v62 = vpop.permute.xlu0 %3257  ;;  %3698 = vmatmul.mubr.msk.bf16.vlgmr.msra.gmra.mrb[28].mxu0 %vm353_vm3, %v3697_v26 }
 0x2da   : > { %3168 = vmatpush1.bf16.msra.mxu0 %v3158_v61  ;;  %3909 = vmatmul.mubr.msk.bf16.vlgmr.msra.gmra.mrb[92].mxu1 %vm353_vm3, %v3697_v26  ;;  %v3262_v1 = vsel %vm1169_vm8, %v3256_v60, %v3258_v62 }
 0x2db   : > { %3913 = vmatpush3.bf16.msra.mxu1 %v3160_v63  ;;  %3270 = vmatprep.subr.bf16.mxu0 %v3262_v1 }
 0x2dc   : > { %v3254_v28 = vpop.permute.xlu1 %3253  ;;  %3199 = vmatprep.mubr.bf16.mxu0 %v4082_v0  ;;  %3914 = vmatprep.mubr.msk.bf16.mxu1 %vm4088_vm0, %v4086_v4 }
 0x2dd   : > { %v3260_v2 = vpop.permute.xlu0 %3259  ;;  %3918 = vmatprep.subr.bf16.mxu1 %v4086_v4  ;;  %v3261_v6 = vsel %vm1169_vm8, %v3254_v28, %v3256_v60 }
 0x2de   : > { %v3263_v8 = vsel %vm1169_vm8, %v3258_v62, %v3260_v2 }
 0x2e0   : > { %v3359_v5 = vpop.permute.xlu1 %3358 }
 0x2e1   : > { %v3361_v7 = vpop.permute.xlu0 %3360  ;;  %3701 = vmatmul.mubr.msk.bf16.vlgmr.msra.gmra.mrb[32].mxu0 %vm353_vm3, %v3700_v3 }
 0x2e2   : > { %3271 = vmatpush1.bf16.msra.mxu0 %v3261_v6  ;;  %3915 = vmatmul.mubr.msk.bf16.vlgmr.msra.gmra.mrb[96].mxu1 %vm353_vm3, %v3700_v3  ;;  %v3365_v9 = vsel %vm1285_vm9, %v3359_v5, %v3361_v7 }
 0x2e3   : > { %3919 = vmatpush3.bf16.msra.mxu1 %v3263_v8  ;;  %3373 = vmatprep.subr.bf16.mxu0 %v3365_v9 }
 0x2e4   : > { %3302 = vmatprep.mubr.bf16.mxu0 %v4082_v0  ;;  %3920 = vmatprep.mubr.msk.bf16.mxu1 %vm4088_vm0, %v4086_v4  ;;  %v3357_v11 = vpop.permute.xlu1 %3356 }
 0x2e5   : > { %3924 = vmatprep.subr.bf16.mxu1 %v4086_v4  ;;  %v3363_v14 = vpop.permute.xlu0 %3362  ;;  %v3364_v15 = vsel %vm1285_vm9, %v3357_v11, %v3359_v5 }
 0x2e6   : > { %v3366_v17 = vsel %vm1285_vm9, %v3361_v7, %v3363_v14 }
 0x2e9   : > { %3704 = vmatmul.mubr.msk.bf16.vlgmr.msra.gmra.mrb[36].mxu0 %vm353_vm3, %v3703_v12 }
 0x2ea   : > { %3374 = vmatpush1.bf16.msra.mxu0 %v3364_v15  ;;  %3921 = vmatmul.mubr.msk.bf16.vlgmr.msra.gmra.mrb[100].mxu1 %vm353_vm3, %v3703_v12 }
 0x2eb   : > { %3925 = vmatpush3.bf16.msra.mxu1 %v3366_v17  ;;  %3405 = vmatprep.mubr.bf16.mxu0 %v4082_v0 }
 0x2ec   : > { %3926 = vmatprep.mubr.msk.bf16.mxu1 %vm4088_vm0, %v4086_v4 }
 0x2f1   : > { %3707 = vmatmul.mubr.msk.bf16.vlgmr.msra.gmra.mrb[40].mxu0 %vm353_vm3, %v3706_v19 }
 0x2f2   : > { %3927 = vmatmul.mubr.msk.bf16.vlgmr.msra.gmra.mrb[104].mxu1 %vm353_vm3, %v3706_v19 }
 0x384   : > { %v2597_v16 = vpop.f32.mrb[8].mxu0 }
 0x385   : > { %v2599_v21 = vpop.f32.mrb[9].mxu0  ;;  %v2638_v23 = vpop.f32.mrb[72].mxu1 }
 0x386   : > { %v2601_v25 = vpop.f32.mrb[10].mxu0  ;;  %v3880_v27 = vpop.f32.mrb[73].mxu1 }
 0x387   : > { %v2602_v29 = vpop.f32.mrb[11].mxu0  ;;  %v2641_v30 = vpop.f32.mrb[74].mxu1 }
 0x388   : > { %v3881_v31 = vpop.f32.mrb[75].mxu1 }
 0x38c   : > { %v2695_v0 = vpop.f32.mrb[12].mxu0 }
 0x38d   : > { %v2696_v32 = vadd.f32 %v2695_v0, %v2597_v16  ;;  %v2697_v33 = vpop.f32.mrb[13].mxu0  ;;  %v2736_v4 = vpop.f32.mrb[76].mxu1 }
 0x38e   : > { %v2698_v34 = vadd.f32 %v2697_v33, %v2599_v21  ;;  %v2737_v35 = vadd.f32 %v2736_v4, %v2638_v23  ;;  %v2699_v36 = vpop.f32.mrb[14].mxu0  ;;  %v3886_v18 = vpop.f32.mrb[77].mxu1 }
 0x38f   : > { %v2700_v37 = vpop.f32.mrb[15].mxu0  ;;  %v2739_v38 = vpop.f32.mrb[78].mxu1 }
 0x390   : > { %v3887_v39 = vpop.f32.mrb[79].mxu1 }
 0x394   : > { %v2795_v40 = vpop.f32.mrb[16].mxu0 }
 0x395   : > { %v2842_v41 = vadd.f32 %v2795_v40, %v2696_v32  ;;  %v2797_v42 = vpop.f32.mrb[17].mxu0  ;;  %v2836_v43 = vpop.f32.mrb[80].mxu1 }
 0x396   : > { %v2843_v44 = vadd.f32 %v2797_v42, %v2698_v34  ;;  %v2844_v45 = vadd.f32 %v2836_v43, %v2737_v35  ;;  %v2799_v46 = vpop.f32.mrb[18].mxu0  ;;  %v3892_v47 = vpop.f32.mrb[81].mxu1 }
 0x397   : > { %v2800_v48 = vpop.f32.mrb[19].mxu0  ;;  %v2839_v49 = vpop.f32.mrb[82].mxu1 }
 0x398   : > { %v3893_v50 = vpop.f32.mrb[83].mxu1 }
 0x39c   : > { %v2898_v51 = vpop.f32.mrb[20].mxu0 }
 0x39d   : > { %v2945_v52 = vadd.f32 %v2898_v51, %v2842_v41  ;;  %v2900_v53 = vpop.f32.mrb[21].mxu0  ;;  %v2939_v54 = vpop.f32.mrb[84].mxu1 }
 0x39e   : > { %v2946_v55 = vadd.f32 %v2900_v53, %v2843_v44  ;;  %v2947_v56 = vadd.f32 %v2939_v54, %v2844_v45  ;;  %v2902_v22 = vpop.f32.mrb[22].mxu0  ;;  %v3898_v57 = vpop.f32.mrb[85].mxu1 }
 0x39f   : > { %v2903_v20 = vpop.f32.mrb[23].mxu0  ;;  %v2942_v24 = vpop.f32.mrb[86].mxu1 }
 0x3a0   : > { %v3899_v58 = vpop.f32.mrb[87].mxu1  ;;  %v3461_v44 = vpop.permute.xlu1 %3460 }
 0x3a4   : > { %v2987_v59 = vpop.f32.mrb[24].mxu0 }
 0x3a5   : > { %v3034_v26 = vadd.f32 %v2987_v59, %v2945_v52  ;;  %v2989_v60 = vpop.f32.mrb[25].mxu0  ;;  %v3028_v61 = vpop.f32.mrb[88].mxu1 }
 0x3a6   : > { %v3035_v62 = vadd.f32 %v2989_v60, %v2946_v55  ;;  %v3036_v63 = vadd.f32 %v3028_v61, %v2947_v56  ;;  %v2991_v1 = vpop.f32.mrb[26].mxu0  ;;  %v3904_v28 = vpop.f32.mrb[89].mxu1 }
 0x3a7   : > { %v2992_v2 = vpop.f32.mrb[27].mxu0  ;;  %v3031_v3 = vpop.f32.mrb[90].mxu1  ;;  %v4093_v1 = vmov 1966171168  }
 0x3a8   : > { %v3905_v5 = vpop.f32.mrb[91].mxu1  ;;  %v3489_v28 = vunpack.c.l.s4 %v4093_v1 }
 0x3aa   : > { %v3490_v2 = vunpack.c.0.s8 %v3489_v28 }
 0x3ac   : > { %v3098_v6 = vpop.f32.mrb[28].mxu0  ;;  %v3493_v5 = vsub.s32 %v3490_v2, %v4575_v13 }
 0x3ad   : > { %v3145_v7 = vadd.f32 %v3098_v6, %v3034_v26  ;;  %v3100_v8 = vpop.f32.mrb[29].mxu0  ;;  %v3139_v9 = vpop.f32.mrb[92].mxu1 }
 0x3ae   : > { %v3146_v11 = vadd.f32 %v3100_v8, %v3035_v62  ;;  %v3147_v12 = vadd.f32 %v3139_v9, %v3036_v63  ;;  %v3102_v14 = vpop.f32.mrb[30].mxu0  ;;  %v3910_v15 = vpop.f32.mrb[93].mxu1 }
 0x3af   : > { %v3103_v17 = vpop.f32.mrb[31].mxu0  ;;  %v3142_v19 = vpop.f32.mrb[94].mxu1 }
 0x3b0   : > { %v3911_v16 = vpop.f32.mrb[95].mxu1 }
 0x3b4   : > { %v3201_v21 = vpop.f32.mrb[32].mxu0 }
 0x3b5   : > { %v3248_v23 = vadd.f32 %v3201_v21, %v3145_v7  ;;  %v3203_v25 = vpop.f32.mrb[33].mxu0  ;;  %v3242_v27 = vpop.f32.mrb[96].mxu1 }
 0x3b6   : > { %v3249_v29 = vadd.f32 %v3203_v25, %v3146_v11  ;;  %v3250_v30 = vadd.f32 %v3242_v27, %v3147_v12  ;;  %v3205_v31 = vpop.f32.mrb[34].mxu0  ;;  %v3916_v0 = vpop.f32.mrb[97].mxu1 }
 0x3b7   : > { %v3206_v32 = vpop.f32.mrb[35].mxu0  ;;  %v3245_v33 = vpop.f32.mrb[98].mxu1 }
 0x3b8   : > { %v3917_v4 = vpop.f32.mrb[99].mxu1 }
 0x3bc   : > { %v3304_v34 = vpop.f32.mrb[36].mxu0 }
 0x3bd   : > { %v3351_v35 = vadd.f32 %v3304_v34, %v3248_v23  ;;  %v3306_v36 = vpop.f32.mrb[37].mxu0  ;;  %v3345_v18 = vpop.f32.mrb[100].mxu1 }
 0x3be   : > { %v3352_v37 = vadd.f32 %v3306_v36, %v3249_v29  ;;  %v3353_v38 = vadd.f32 %v3345_v18, %v3250_v30  ;;  %v3308_v39 = vpop.f32.mrb[38].mxu0  ;;  %v3922_v40 = vpop.f32.mrb[101].mxu1 }
 0x3bf   : > { %v3309_v41 = vpop.f32.mrb[39].mxu0  ;;  %v3348_v42 = vpop.f32.mrb[102].mxu1 }
 0x3c0   : > { %v3923_v43 = vpop.f32.mrb[103].mxu1 }
 0x3c4   : > { %v3407_v45 = vpop.f32.mrb[40].mxu0 }
 0x3c5   : > { %v3454_v46 = vadd.f32 %v3407_v45, %v3351_v35  ;;  %v3409_v47 = vpop.f32.mrb[41].mxu0  ;;  %v3448_v48 = vpop.f32.mrb[104].mxu1 }
 0x3c6   : > { %v3455_v49 = vadd.f32 %v3409_v47, %v3352_v37  ;;  %v3456_v50 = vadd.f32 %v3448_v48, %v3353_v38  ;;  %v3411_v51 = vpop.f32.mrb[42].mxu0  ;;  %v3928_v52 = vpop.f32.mrb[105].mxu1 }
 0x3c7   : > { %v3463_v53 = vadd.f32 %v3461_v44, %v3454_v46  ;;  %v3412_v54 = vpop.f32.mrb[43].mxu0  ;;  %v3451_v55 = vpop.f32.mrb[106].mxu1 }
 0x3c8   : > { %v3464_v56 = vadd.f32 %v3461_v44, %v3455_v49  ;;  %v3465_v22 = vadd.f32 %v3461_v44, %v3456_v50  ;;  %v3929_v57 = vpop.f32.mrb[107].mxu1 }
 0x3c9   : > { %v3709_v20 = vmul.f32 -1.442695, %v3463_v53 }
 0x3ca   : > { %v3710_v24 = vmul.f32 -1.442695, %v3464_v56  ;;  %v3711_v58 = vmul.f32 -1.442695, %v3465_v22 }
 0x3cb   : > { %4062 = vpow2.f32 %v3709_v20 }
 0x3cc   : > { %4064 = vpow2.f32 %v3710_v24 }
 0x3cd   : > { %4066 = vpow2.f32 %v3711_v58 }
 0x3d5   : > { %v4063_v59 = vpop.eup %4062 }
 0x3d6   : > { %v4065_v26 = vpop.eup %4064  ;;  %v3475_v60 = vadd.f32 1.0, %v4063_v59 }
 0x3d7   : > { %v4067_v61 = vpop.eup %4066  ;;  %v3476_v62 = vadd.f32 1.0, %v4065_v26 }
 0x3d8   : > { %4068 = vrcp.f32 %v3475_v60  ;;  %v3477_v63 = vadd.f32 1.0, %v4067_v61 }
 0x3d9   : > { %4070 = vrcp.f32 %v3476_v62 }
 0x3da   : > { %4072 = vrcp.f32 %v3477_v63 }
 0x3e2   : > { %v4069_v3 = vpop.eup %4068 }
 0x3e3   : > { %v4071_v6 = vpop.eup %4070 }
 0x3e4   : > { %v4073_v7 = vpop.eup %4072  ;;  %v3487_v8 = vcombine.low %v4069_v3, %v4071_v6 }
 0x3e5   : > { %v3501_v11 = vrot.slane %v4073_v7, %v3493_v5 }
 0x3e6   : > { %v3494_v9 = vrot.slane %v3487_v8, %v3493_v5 }
 0x3e8   : > { %v3502_v12 = vcombine.low %v3494_v9, %v3501_v11 }
 0x3ea   : > { %v3509_v14 = vrot.slane %v3502_v12, %v3493_v5 }
 0x3ec   : > { %3515 = vst.msk [vmem:[%s303_s14] sm:$0x7] %vm3513_vm10, %v3509_v14 }
 0x3ed PF: > { %s18_s27 = sadd.s32 1, %s4080_s27  }
 0x3ee   : > { %p15_p4 = scmp.ge.s32.totalorder %s18_s27, 4  }
 0x3f0   :  { %17 = sbr.rel (!%p15_p4) target bundleno = 1 (0x1), region = 106 }

</bundles_post_ra>
